<compile_context>
chip_gen: v7x
topology: tpu7x:2x2x1
jax: 0.10.0
libtpu: 0.0.40
codegen_flags: <defaults>
</compile_context>

<pallas_src>
import jax
import jax.numpy as jnp
from jax.experimental import pallas as pl
from jax.experimental.pallas import tpu as pltpu

IN_DIM = 28
OUT_DIM = 28          # must equal IN_DIM for the residual add (as in PyTorch)
H_DIM = 300
H_PAD = 384           # 3 * 128: lane-aligned hidden width (zero-padded)


def _round_up(n, m):
    return (n + m - 1) // m * m


def _mlp_residual_kernel(x_ref,
                         w1, b1, w2, b2, w3, b3, w4, b4, w5, b5, w6, b6,
                         o_ref):
    x = x_ref[...]                       # (TILE_B, 28) f32
    cdt = w1.dtype                       # compute dtype for MXU inputs (bf16)

    def dense(h, w_ref, b_ref):
        # bf16 MXU inputs, f32 accumulation, f32 bias add.
        return jnp.dot(h.astype(cdt), w_ref[...],
                       preferred_element_type=jnp.float32) + b_ref[...]

    h = jnp.maximum(dense(x, w1, b1), 0.0)
    h = jnp.maximum(dense(h, w2, b2), 0.0)
    h = jnp.maximum(dense(h, w3, b3), 0.0)
    h = jnp.maximum(dense(h, w4, b4), 0.0)
    h = jnp.maximum(dense(h, w5, b5), 0.0)
    y = dense(h, w6, b6)

    o_ref[...] = y + x                   # residual (f32)


def another_dn_forward(x, params, *, tile_b=128, compute_dtype=jnp.bfloat16):
    """x: (B, 28) f32.  params: list of (W, b) with W already (in, out) f32."""
    B, f = x.shape
    assert f == IN_DIM

    # --- pad hidden dim 300 -> 384 with zeros; cast weights to compute dtype.
    # Zero padding is exactly preserved through ReLU, so numerics match the
    # unpadded network (padded W6 rows are zero -> no contribution to output).
    flat = []
    n_layers = len(params)
    for li, (w, b) in enumerate(params):
        fi, fo = w.shape
        fi_p = IN_DIM if li == 0 else H_PAD
        fo_p = OUT_DIM if li == n_layers - 1 else H_PAD
        wp = jnp.zeros((fi_p, fo_p), jnp.float32).at[:fi, :fo].set(w)
        bp = jnp.zeros((1, fo_p), jnp.float32).at[:, :fo].set(b)
        flat.append(wp.astype(compute_dtype))   # bf16 weights (half the DMA)
        flat.append(bp)                         # f32 biases

    # --- batch tiling: pad batch to a multiple of the tile, grid over tiles.
    tb = min(tile_b, _round_up(B, 8))
    b_pad = _round_up(B, tb)
    xp = x if b_pad == B else jnp.pad(x, ((0, b_pad - B), (0, 0)))
    grid = (b_pad // tb,)

    act_spec = pl.BlockSpec((tb, IN_DIM), lambda i: (i, 0))
    out_spec = pl.BlockSpec((tb, OUT_DIM), lambda i: (i, 0))
    # Constant block index across the batch grid => weights/biases stay
    # resident in VMEM while activation tiles are double-buffered.
    const_specs = [pl.BlockSpec(a.shape, lambda i: (0, 0)) for a in flat]

    out = pl.pallas_call(
        _mlp_residual_kernel,
        out_shape=jax.ShapeDtypeStruct((b_pad, OUT_DIM), jnp.float32),
        grid=grid,
        in_specs=[act_spec] + const_specs,
        out_specs=out_spec,
        compiler_params=pltpu.CompilerParams(
            dimension_semantics=("parallel",)),   # dual-TC sharding on v7x
    )(xp, *flat)

    return out[:B]


def _init_params(key):
    """Deterministic synthetic init matching the PyTorch layer shapes.

    PyTorch nn.Linear(in, out) has weight (out, in); we store the transpose
    (in, out) so the kernel computes x @ W + b directly.
    """
    dims = [(IN_DIM, H_DIM), (H_DIM, H_DIM), (H_DIM, H_DIM),
            (H_DIM, H_DIM), (H_DIM, H_DIM), (H_DIM, OUT_DIM)]
    params = []
    for (fan_in, fan_out) in dims:
        key, kw, kb = jax.random.split(key, 3)
        bound = 1.0 / jnp.sqrt(jnp.float32(fan_in))
        w = jax.random.uniform(kw, (fan_in, fan_out), jnp.float32, -bound, bound)
        b = jax.random.uniform(kb, (1, fan_out), jnp.float32, -bound, bound)
        params.append((w, b))
    return params


def _reference_forward(x, params, compute_dtype=jnp.bfloat16):
    """Pure-JAX reference mirroring the kernel's bf16-input / f32-accumulate math."""
    h = x
    for i, (w, b) in enumerate(params):
        h = jnp.dot(h.astype(compute_dtype), w.astype(compute_dtype),
                    preferred_element_type=jnp.float32) + b
        if i < len(params) - 1:
            h = jnp.maximum(h, 0.0)
    return h + x


if __name__ == "__main__":
    key = jax.random.PRNGKey(0)
    key, kx = jax.random.split(key)

    batch = 8
    x = jax.random.normal(kx, (batch, IN_DIM), jnp.float32)

    params = _init_params(key)

    out = another_dn_forward(x, params)
    out = jax.block_until_ready(out)

    ref = _reference_forward(x, params)
    assert out.shape == (batch, OUT_DIM)
    assert jnp.allclose(out, ref, atol=2e-3, rtol=2e-3), "mismatch vs JAX reference"

    print("KERNEL_OK")
</pallas_src>

<mosaic_0001>
module attributes {stable_mosaic.version = 11 : i64} {
  func.func @_mlp_residual_kernel(%arg0: i32, %arg1: memref<8x28xf32, #tpu.memory_space<vmem>>, %arg2: memref<28x384xbf16, #tpu.memory_space<vmem>>, %arg3: memref<1x384xf32, #tpu.memory_space<vmem>>, %arg4: memref<384x384xbf16, #tpu.memory_space<vmem>>, %arg5: memref<1x384xf32, #tpu.memory_space<vmem>>, %arg6: memref<384x384xbf16, #tpu.memory_space<vmem>>, %arg7: memref<1x384xf32, #tpu.memory_space<vmem>>, %arg8: memref<384x384xbf16, #tpu.memory_space<vmem>>, %arg9: memref<1x384xf32, #tpu.memory_space<vmem>>, %arg10: memref<384x384xbf16, #tpu.memory_space<vmem>>, %arg11: memref<1x384xf32, #tpu.memory_space<vmem>>, %arg12: memref<384x28xbf16, #tpu.memory_space<vmem>>, %arg13: memref<1x28xf32, #tpu.memory_space<vmem>>, %arg14: memref<8x28xf32, #tpu.memory_space<vmem>>) attributes {dimension_semantics = [#tpu.dimension_semantics<parallel>], iteration_bounds = array<i64: 1>, scalar_prefetch = 0 : i64, scratch_operands = 0 : i64, tpu.core_type = #tpu.core_type<tc>, window_params = [{transform_indices = @transform_0, window_bounds = array<i64: 8, 28>}, {pipeline_mode = #tpu.pipeline_mode<synchronous>, transform_indices = @transform_1, window_bounds = array<i64: 28, 384>}, {pipeline_mode = #tpu.pipeline_mode<synchronous>, transform_indices = @transform_2, window_bounds = array<i64: 1, 384>}, {pipeline_mode = #tpu.pipeline_mode<synchronous>, transform_indices = @transform_3, window_bounds = array<i64: 384, 384>}, {pipeline_mode = #tpu.pipeline_mode<synchronous>, transform_indices = @transform_4, window_bounds = array<i64: 1, 384>}, {pipeline_mode = #tpu.pipeline_mode<synchronous>, transform_indices = @transform_5, window_bounds = array<i64: 384, 384>}, {pipeline_mode = #tpu.pipeline_mode<synchronous>, transform_indices = @transform_6, window_bounds = array<i64: 1, 384>}, {pipeline_mode = #tpu.pipeline_mode<synchronous>, transform_indices = @transform_7, window_bounds = array<i64: 384, 384>}, {pipeline_mode = #tpu.pipeline_mode<synchronous>, transform_indices = @transform_8, window_bounds = array<i64: 1, 384>}, {pipeline_mode = #tpu.pipeline_mode<synchronous>, transform_indices = @transform_9, window_bounds = array<i64: 384, 384>}, {pipeline_mode = #tpu.pipeline_mode<synchronous>, transform_indices = @transform_10, window_bounds = array<i64: 1, 384>}, {pipeline_mode = #tpu.pipeline_mode<synchronous>, transform_indices = @transform_11, window_bounds = array<i64: 384, 28>}, {pipeline_mode = #tpu.pipeline_mode<synchronous>, transform_indices = @transform_12, window_bounds = array<i64: 1, 28>}, {transform_indices = @transform_13, window_bounds = array<i64: 8, 28>}]} {
    %c0 = arith.constant 0 : index
    %c0_0 = arith.constant 0 : index
    %0 = vector.load %arg1[%c0, %c0_0] : memref<8x28xf32, #tpu.memory_space<vmem>>, vector<8x28xf32>
    %1 = arith.truncf %0 : vector<8x28xf32> to vector<8x28xbf16>
    %c0_1 = arith.constant 0 : index
    %c0_2 = arith.constant 0 : index
    %2 = vector.load %arg2[%c0_1, %c0_2] : memref<28x384xbf16, #tpu.memory_space<vmem>>, vector<28x384xbf16>
    %cst = arith.constant dense<0.000000e+00> : vector<8x384xf32>
    %3 = tpu.matmul %1, %2, %cst {dimension_numbers = #tpu.dot_dimension_numbers<[1], [0], [0], [1], [0, 0, 1, 1], [], []>} : vector<8x28xbf16>, vector<28x384xbf16>, vector<8x384xf32> -> vector<8x384xf32>
    %c0_3 = arith.constant 0 : index
    %c0_4 = arith.constant 0 : index
    %4 = vector.load %arg3[%c0_3, %c0_4] : memref<1x384xf32, #tpu.memory_space<vmem>>, vector<1x384xf32>
    %5 = vector.broadcast %4 : vector<1x384xf32> to vector<8x384xf32>
    %6 = arith.addf %3, %5 : vector<8x384xf32>
    %cst_5 = arith.constant 0.000000e+00 : f32
    %7 = vector.broadcast %cst_5 : f32 to vector<8x384xf32>
    %8 = arith.maximumf %6, %7 : vector<8x384xf32>
    %9 = arith.truncf %8 : vector<8x384xf32> to vector<8x384xbf16>
    %c0_6 = arith.constant 0 : index
    %c0_7 = arith.constant 0 : index
    %10 = vector.load %arg4[%c0_6, %c0_7] : memref<384x384xbf16, #tpu.memory_space<vmem>>, vector<384x384xbf16>
    %cst_8 = arith.constant dense<0.000000e+00> : vector<8x384xf32>
    %11 = tpu.matmul %9, %10, %cst_8 {dimension_numbers = #tpu.dot_dimension_numbers<[1], [0], [0], [1], [0, 0, 1, 1], [], []>} : vector<8x384xbf16>, vector<384x384xbf16>, vector<8x384xf32> -> vector<8x384xf32>
    %c0_9 = arith.constant 0 : index
    %c0_10 = arith.constant 0 : index
    %12 = vector.load %arg5[%c0_9, %c0_10] : memref<1x384xf32, #tpu.memory_space<vmem>>, vector<1x384xf32>
    %13 = vector.broadcast %12 : vector<1x384xf32> to vector<8x384xf32>
    %14 = arith.addf %11, %13 : vector<8x384xf32>
    %cst_11 = arith.constant 0.000000e+00 : f32
    %15 = vector.broadcast %cst_11 : f32 to vector<8x384xf32>
    %16 = arith.maximumf %14, %15 : vector<8x384xf32>
    %17 = arith.truncf %16 : vector<8x384xf32> to vector<8x384xbf16>
    %c0_12 = arith.constant 0 : index
    %c0_13 = arith.constant 0 : index
    %18 = vector.load %arg6[%c0_12, %c0_13] : memref<384x384xbf16, #tpu.memory_space<vmem>>, vector<384x384xbf16>
    %cst_14 = arith.constant dense<0.000000e+00> : vector<8x384xf32>
    %19 = tpu.matmul %17, %18, %cst_14 {dimension_numbers = #tpu.dot_dimension_numbers<[1], [0], [0], [1], [0, 0, 1, 1], [], []>} : vector<8x384xbf16>, vector<384x384xbf16>, vector<8x384xf32> -> vector<8x384xf32>
    %c0_15 = arith.constant 0 : index
    %c0_16 = arith.constant 0 : index
    %20 = vector.load %arg7[%c0_15, %c0_16] : memref<1x384xf32, #tpu.memory_space<vmem>>, vector<1x384xf32>
    %21 = vector.broadcast %20 : vector<1x384xf32> to vector<8x384xf32>
    %22 = arith.addf %19, %21 : vector<8x384xf32>
    %cst_17 = arith.constant 0.000000e+00 : f32
    %23 = vector.broadcast %cst_17 : f32 to vector<8x384xf32>
    %24 = arith.maximumf %22, %23 : vector<8x384xf32>
    %25 = arith.truncf %24 : vector<8x384xf32> to vector<8x384xbf16>
    %c0_18 = arith.constant 0 : index
    %c0_19 = arith.constant 0 : index
    %26 = vector.load %arg8[%c0_18, %c0_19] : memref<384x384xbf16, #tpu.memory_space<vmem>>, vector<384x384xbf16>
    %cst_20 = arith.constant dense<0.000000e+00> : vector<8x384xf32>
    %27 = tpu.matmul %25, %26, %cst_20 {dimension_numbers = #tpu.dot_dimension_numbers<[1], [0], [0], [1], [0, 0, 1, 1], [], []>} : vector<8x384xbf16>, vector<384x384xbf16>, vector<8x384xf32> -> vector<8x384xf32>
    %c0_21 = arith.constant 0 : index
    %c0_22 = arith.constant 0 : index
    %28 = vector.load %arg9[%c0_21, %c0_22] : memref<1x384xf32, #tpu.memory_space<vmem>>, vector<1x384xf32>
    %29 = vector.broadcast %28 : vector<1x384xf32> to vector<8x384xf32>
    %30 = arith.addf %27, %29 : vector<8x384xf32>
    %cst_23 = arith.constant 0.000000e+00 : f32
    %31 = vector.broadcast %cst_23 : f32 to vector<8x384xf32>
    %32 = arith.maximumf %30, %31 : vector<8x384xf32>
    %33 = arith.truncf %32 : vector<8x384xf32> to vector<8x384xbf16>
    %c0_24 = arith.constant 0 : index
    %c0_25 = arith.constant 0 : index
    %34 = vector.load %arg10[%c0_24, %c0_25] : memref<384x384xbf16, #tpu.memory_space<vmem>>, vector<384x384xbf16>
    %cst_26 = arith.constant dense<0.000000e+00> : vector<8x384xf32>
    %35 = tpu.matmul %33, %34, %cst_26 {dimension_numbers = #tpu.dot_dimension_numbers<[1], [0], [0], [1], [0, 0, 1, 1], [], []>} : vector<8x384xbf16>, vector<384x384xbf16>, vector<8x384xf32> -> vector<8x384xf32>
    %c0_27 = arith.constant 0 : index
    %c0_28 = arith.constant 0 : index
    %36 = vector.load %arg11[%c0_27, %c0_28] : memref<1x384xf32, #tpu.memory_space<vmem>>, vector<1x384xf32>
    %37 = vector.broadcast %36 : vector<1x384xf32> to vector<8x384xf32>
    %38 = arith.addf %35, %37 : vector<8x384xf32>
    %cst_29 = arith.constant 0.000000e+00 : f32
    %39 = vector.broadcast %cst_29 : f32 to vector<8x384xf32>
    %40 = arith.maximumf %38, %39 : vector<8x384xf32>
    %41 = arith.truncf %40 : vector<8x384xf32> to vector<8x384xbf16>
    %c0_30 = arith.constant 0 : index
    %c0_31 = arith.constant 0 : index
    %42 = vector.load %arg12[%c0_30, %c0_31] : memref<384x28xbf16, #tpu.memory_space<vmem>>, vector<384x28xbf16>
    %cst_32 = arith.constant dense<0.000000e+00> : vector<8x28xf32>
    %43 = tpu.matmul %41, %42, %cst_32 {dimension_numbers = #tpu.dot_dimension_numbers<[1], [0], [0], [1], [0, 0, 1, 1], [], []>} : vector<8x384xbf16>, vector<384x28xbf16>, vector<8x28xf32> -> vector<8x28xf32>
    %c0_33 = arith.constant 0 : index
    %c0_34 = arith.constant 0 : index
    %44 = vector.load %arg13[%c0_33, %c0_34] : memref<1x28xf32, #tpu.memory_space<vmem>>, vector<1x28xf32>
    %45 = vector.broadcast %44 : vector<1x28xf32> to vector<8x28xf32>
    %46 = arith.addf %43, %45 : vector<8x28xf32>
    %47 = arith.addf %46, %0 : vector<8x28xf32>
    %c0_35 = arith.constant 0 : index
    %c0_36 = arith.constant 0 : index
    %48 = vector.load %arg14[%c0_35, %c0_36] : memref<8x28xf32, #tpu.memory_space<vmem>>, vector<8x28xf32>
    tpu.vector_store %arg14[%c0_35, %c0_36], %47 {strides = array<i32>} : memref<8x28xf32, #tpu.memory_space<vmem>>, vector<8x28xf32>,
    return
  }
  func.func @transform_0(%arg0: i32) -> (i32, i32) {
    %c0_i32 = arith.constant 0 : i32
    %c0_i32_0 = arith.constant 0 : i32
    return %arg0, %c0_i32 : i32, i32
  }
  func.func @transform_1(%arg0: i32) -> (i32, i32) {
    %c0_i32 = arith.constant 0 : i32
    %c0_i32_0 = arith.constant 0 : i32
    %c0_i32_1 = arith.constant 0 : i32
    return %c0_i32, %c0_i32_0 : i32, i32
  }
  func.func @transform_2(%arg0: i32) -> (i32, i32) {
    %c0_i32 = arith.constant 0 : i32
    %c0_i32_0 = arith.constant 0 : i32
    %c0_i32_1 = arith.constant 0 : i32
    return %c0_i32, %c0_i32_0 : i32, i32
  }
  func.func @transform_3(%arg0: i32) -> (i32, i32) {
    %c0_i32 = arith.constant 0 : i32
    %c0_i32_0 = arith.constant 0 : i32
    %c0_i32_1 = arith.constant 0 : i32
    return %c0_i32, %c0_i32_0 : i32, i32
  }
  func.func @transform_4(%arg0: i32) -> (i32, i32) {
    %c0_i32 = arith.constant 0 : i32
    %c0_i32_0 = arith.constant 0 : i32
    %c0_i32_1 = arith.constant 0 : i32
    return %c0_i32, %c0_i32_0 : i32, i32
  }
  func.func @transform_5(%arg0: i32) -> (i32, i32) {
    %c0_i32 = arith.constant 0 : i32
    %c0_i32_0 = arith.constant 0 : i32
    %c0_i32_1 = arith.constant 0 : i32
    return %c0_i32, %c0_i32_0 : i32, i32
  }
  func.func @transform_6(%arg0: i32) -> (i32, i32) {
    %c0_i32 = arith.constant 0 : i32
    %c0_i32_0 = arith.constant 0 : i32
    %c0_i32_1 = arith.constant 0 : i32
    return %c0_i32, %c0_i32_0 : i32, i32
  }
  func.func @transform_7(%arg0: i32) -> (i32, i32) {
    %c0_i32 = arith.constant 0 : i32
    %c0_i32_0 = arith.constant 0 : i32
    %c0_i32_1 = arith.constant 0 : i32
    return %c0_i32, %c0_i32_0 : i32, i32
  }
  func.func @transform_8(%arg0: i32) -> (i32, i32) {
    %c0_i32 = arith.constant 0 : i32
    %c0_i32_0 = arith.constant 0 : i32
    %c0_i32_1 = arith.constant 0 : i32
    return %c0_i32, %c0_i32_0 : i32, i32
  }
  func.func @transform_9(%arg0: i32) -> (i32, i32) {
    %c0_i32 = arith.constant 0 : i32
    %c0_i32_0 = arith.constant 0 : i32
    %c0_i32_1 = arith.constant 0 : i32
    return %c0_i32, %c0_i32_0 : i32, i32
  }
  func.func @transform_10(%arg0: i32) -> (i32, i32) {
    %c0_i32 = arith.constant 0 : i32
    %c0_i32_0 = arith.constant 0 : i32
    %c0_i32_1 = arith.constant 0 : i32
    return %c0_i32, %c0_i32_0 : i32, i32
  }
  func.func @transform_11(%arg0: i32) -> (i32, i32) {
    %c0_i32 = arith.constant 0 : i32
    %c0_i32_0 = arith.constant 0 : i32
    %c0_i32_1 = arith.constant 0 : i32
    return %c0_i32, %c0_i32_0 : i32, i32
  }
  func.func @transform_12(%arg0: i32) -> (i32, i32) {
    %c0_i32 = arith.constant 0 : i32
    %c0_i32_0 = arith.constant 0 : i32
    %c0_i32_1 = arith.constant 0 : i32
    return %c0_i32, %c0_i32_0 : i32, i32
  }
  func.func @transform_13(%arg0: i32) -> (i32, i32) {
    %c0_i32 = arith.constant 0 : i32
    %c0_i32_0 = arith.constant 0 : i32
    return %arg0, %c0_i32 : i32, i32
  }
}

</mosaic_0001>

<bundles_post_ra>
// kernel: tpu_custom_call.1
= control target key start
LH: loop header
LB: loop body
LE: loop exit
PB: predicated region body
PF: predicated region fallthrough
CT: control target
= control target key end

     0   :  { %18 = vsyncpa [#allocation3], 0  ;;  %s4753_s0 = inlined_call_operand.vmem [shape: f32[8,28], index: 0, kind: input, shape index: {}]   ;;  %s4754_s1 = inlined_call_operand.vmem [shape: bf16[28,384], index: 1, kind: input, shape index: {}]   ;;  %s4755_s2 = inlined_call_operand.vmem [shape: f32[1,384], index: 2, kind: input, shape index: {}]   ;;  %s4756_s3 = inlined_call_operand.hbm [shape: bf16[384,384], index: 3, kind: input, shape index: {}]   ;;  %s4757_s4 = inlined_call_operand.vmem [shape: f32[1,384], index: 4, kind: input, shape index: {}]   ;;  %s4758_s5 = inlined_call_operand.hbm [shape: bf16[384,384], index: 5, kind: input, shape index: {}]   ;;  %s4759_s6 = inlined_call_operand.vmem [shape: f32[1,384], index: 6, kind: input, shape index: {}]   ;;  %s4760_s7 = inlined_call_operand.hbm [shape: bf16[384,384], index: 7, kind: input, shape index: {}]   ;;  %s4761_s8 = inlined_call_operand.vmem [shape: f32[1,384], index: 8, kind: input, shape index: {}]   ;;  %s4762_s9 = inlined_call_operand.hbm [shape: bf16[384,384], index: 9, kind: input, shape index: {}]   ;;  %s4763_s10 = inlined_call_operand.vmem [shape: f32[1,384], index: 10, kind: input, shape index: {}]   ;;  %s4764_s11 = inlined_call_operand.vmem [shape: bf16[384,28], index: 11, kind: input, shape index: {}]   ;;  %s4765_s12 = inlined_call_operand.vmem [shape: f32[1,28], index: 12, kind: input, shape index: {}]   ;;  %s4766_s13 = inlined_call_operand.hbm [shape: f32[8,28], index: 13, kind: output, shape index: {}]  }
   0x1   :  { %19 = vsyncpa [#allocation6], 0 }
   0x2   :  { %20 = vsyncpa [#allocation9], 0 }
   0x3   :  { %21 = vsyncpa [#allocation4], 0  ;;  %s4373_s25 = smov [#allocation5]   ;;  %s4374_s27 = smov [#allocation2]  }
   0x4   :  { %s47_s26 = sshll.u32 %s4373_s25, 4  ;;  %s33_s28 = sshll.u32 %s4374_s27, 4  ;;  %s48_s26 = int_to_ptr.vmem [resolvable:$true] %s47_s26  ;;  %s4453_s28 = int_to_ptr.vmem [resolvable:$true] %s33_s28 }
   0x5   :  { %s4255_s14 = scalar_lea.hbm %s4758_s5, 9216 }
   0x6   :  { %p4256_p0 = scmp.ne.s32.totalorder %s4758_s5, %s4255_s14  ;;  %p4259_p1 = scmp.lt.u32.totalorder %s4255_s14, %s4758_s5 }
   0x8   :  { %p4261_p2 = pnand %p4259_p1, %p4256_p0 }
   0xa   :  { %4264 = shalt.err (!%p4261_p2)
}
   0xb   :  { %s4265_s19 = scalar_lea.vmem %s48_s26, 9216  ;;  %p4270_p4 = scmp.lt.s32.totalorder %s48_s26, %s48_s26 }
   0xc   :  { %p4266_p3 = scmp.ne.s32.totalorder %s48_s26, %s4265_s19  ;;  %p4271_p5 = scmp.lt.s32.totalorder %s4265_s19, %s4265_s19 }
   0xe   :  { %p4272_p6 = por %p4271_p5, %p4270_p4 }
  0x10   :  { %p4273_p7 = pnand %p4272_p6, %p4266_p3 }
  0x12   :  { %4276 = shalt.err (!%p4273_p7)
}
  0x13   :  { %s4375_s20 = smov 192   ;;  %s4376_s21 = smov 12  }
  0x14   :  { %53 = dma.hbm_to_vmem [thread:$0]  %s4758_s5, 9216, %s48_s26, [#allocation6], %s4375_s20, %s4375_s20, %s4376_s21  }
  0x15   :  { %s4277_s27 = scalar_lea.hbm %s4756_s3, 9216 }
  0x16   :  { %p4278_p8 = scmp.ne.s32.totalorder %s4756_s3, %s4277_s27  ;;  %p4281_p9 = scmp.lt.u32.totalorder %s4277_s27, %s4756_s3 }
  0x18   :  { %p4283_p10 = pnand %p4281_p9, %p4278_p8 }
  0x1a   :  { %4286 = shalt.err (!%p4283_p10)
}
  0x1b   :  { %s4287_s16 = scalar_lea.vmem %s4453_s28, 9216  ;;  %p4292_p12 = scmp.lt.s32.totalorder %s4453_s28, %s4453_s28 }
  0x1c   :  { %p4288_p11 = scmp.ne.s32.totalorder %s4453_s28, %s4287_s16  ;;  %p4293_p13 = scmp.lt.s32.totalorder %s4287_s16, %s4287_s16 }
  0x1e   :  { %p4294_p0 = por %p4293_p13, %p4292_p12 }
  0x20   :  { %p4295_p1 = pnand %p4294_p0, %p4288_p11 }
  0x22   :  { %4298 = shalt.err (!%p4295_p1)
}
  0x23   :  { %39 = dma.hbm_to_vmem [thread:$0]  %s4756_s3, 9216, %s4453_s28, [#allocation3], %s4375_s20, %s4375_s20, %s4376_s21  }
  0x24   :  { %s4377_s17 = smov [#allocation7]   ;;  %s4378_s19 = smov [#allocation8]  }
  0x25   :  { %s61_s18 = sshll.u32 %s4377_s17, 4  ;;  %s75_s22 = sshll.u32 %s4378_s19, 4  ;;  %s62_s18 = int_to_ptr.vmem [resolvable:$true] %s61_s18  ;;  %s4490_s22 = int_to_ptr.vmem [resolvable:$true] %s75_s22 }
  0x26   :  { %s4299_s25 = scalar_lea.hbm %s4760_s7, 9216 }
  0x27   :  { %p4300_p2 = scmp.ne.s32.totalorder %s4760_s7, %s4299_s25  ;;  %p4303_p3 = scmp.lt.u32.totalorder %s4299_s25, %s4760_s7 }
  0x29   :  { %p4305_p4 = pnand %p4303_p3, %p4300_p2 }
  0x2b   :  { %4308 = shalt.err (!%p4305_p4)
}
  0x2c   :  { %s4309_s3 = scalar_lea.vmem %s62_s18, 9216  ;;  %p4314_p6 = scmp.lt.s32.totalorder %s62_s18, %s62_s18 }
  0x2d   :  { %p4310_p5 = scmp.ne.s32.totalorder %s62_s18, %s4309_s3  ;;  %p4315_p7 = scmp.lt.s32.totalorder %s4309_s3, %s4309_s3 }
  0x2f   :  { %p4316_p8 = por %p4315_p7, %p4314_p6 }
  0x31   :  { %p4317_p9 = pnand %p4316_p8, %p4310_p5 }
  0x33   :  { %4320 = shalt.err (!%p4317_p9)
}
  0x34   :  { %67 = dma.hbm_to_vmem [thread:$0]  %s4760_s7, 9216, %s62_s18, [#allocation6], %s4375_s20, %s4375_s20, %s4376_s21  }
  0x35   :  { %s4321_s26 = scalar_lea.hbm %s4762_s9, 9216 }
  0x36   :  { %p4322_p10 = scmp.ne.s32.totalorder %s4762_s9, %s4321_s26  ;;  %p4325_p11 = scmp.lt.u32.totalorder %s4321_s26, %s4762_s9 }
  0x38   :  { %p4327_p12 = pnand %p4325_p11, %p4322_p10 }
  0x3a   :  { %4330 = shalt.err (!%p4327_p12)
}
  0x3b   :  { %s4331_s25 = scalar_lea.vmem %s4490_s22, 9216  ;;  %p4336_p0 = scmp.lt.s32.totalorder %s4490_s22, %s4490_s22 }
  0x3c   :  { %p4332_p13 = scmp.ne.s32.totalorder %s4490_s22, %s4331_s25  ;;  %p4337_p1 = scmp.lt.s32.totalorder %s4331_s25, %s4331_s25 }
  0x3e   :  { %p4338_p2 = por %p4337_p1, %p4336_p0 }
  0x40   :  { %p4339_p3 = pnand %p4338_p2, %p4332_p13 }
  0x42   :  { %4342 = shalt.err (!%p4339_p3)
}
  0x43   :  { %81 = dma.hbm_to_vmem [thread:$0]  %s4762_s9, 9216, %s4490_s22, [#allocation9], %s4375_s20, %s4375_s20, %s4376_s21  }
  0x44   :  { %4365 = dma.done.wait [#allocation3], 9216  }
  0x45   :  { %4366 = vsyncadd [#allocation3], 4294958080 }
  0x46   :  { %4367 = dma.done.wait [#allocation6], 18432  }
  0x47   :  { %4368 = vsyncadd [#allocation6], 4294948864 }
  0x48   :  { %4369 = dma.done.wait [#allocation9], 9216  }
  0x49   :  { %4370 = vsyncadd [#allocation9], 4294958080  ;;  %v4379_v0 = vmov 0   ;;  %v4380_v1 = vmov 0.0   ;;  %vm4381_vm0 = vmmov 0   ;;  %vm161_vm1 = vcmask 1045504  }
  0x4a   :  { %203 = vmatprep.mubr.bf16.mxu0 %v4379_v0  ;;  %3696 = vmatprep.subr.bf16.mxu1 %v4380_v1  ;;  %v3838_v2 = vld [vmem:[%s4754_s1 + $0x4] ss:$12 sps:$4 sm:$0xff]   ;;  %v3840_v3 = vld [vmem:[%s4754_s1] ss:$12 sps:$4 sm:$0xff]   ;;  %v3844_v8 = vld [vmem:[%s4754_s1 + $0x8] ss:$12 sps:$4 sm:$0xff]   ;;  %v113_v61 = vlaneseq }
  0x4b   :  { %3700 = vmatprep.mubr.msk.bf16.mxu1 %vm4381_vm0, %v4380_v1  ;;  %171 = vmatprep.subr.bf16.mxu0 %v3838_v2  ;;  %v3841_v4 = vld [vmem:[%s4754_s1 + $0x1c] ss:$12 sps:$4 sm:$0x3f]   ;;  %v3843_v5 = vld [vmem:[%s4754_s1 + $0x18] ss:$12 sps:$4 sm:$0x3f]  }
  0x4c   :  { %172 = vmatpush1.bf16.msra.mxu0 %v3840_v3  ;;  %v101_v6 = vld [vmem:[%s4753_s0] sm:$0xff]  ;;  %v163_v7 = vsel %vm161_vm1, %v3843_v5, 0  ;;  %3697 = vmatpush3.bf16.msra.mxu1 %v3844_v8  ;;  %vm157_vm2 = vcmask 228352   ;;  %v3851_v14 = vld [vmem:[#allocation2 + $0x1c] ss:$12 sps:$4 sm:$0xff]   ;;  %v114_v62 = vshrl.u32 %v113_v61, 7 }
  0x4d   :  { %3222 = vmatprep.subr.msk.bf16.mxu0 %vm161_vm1, %v3841_v4  ;;  %v3845_v9 = vld [vmem:[%s4754_s1 + $0x20] ss:$12 sps:$4 sm:$0x3f]   ;;  %v102_v10 = vpack.c.bf16 %v101_v6, %v101_v6  ;;  %v3848_v11 = vld [vmem:[#allocation2 + $0x4] ss:$12 sps:$4 sm:$0xff]   ;;  %3698 = vmatprep.subr.bf16.mxu1 %v4380_v1 }
  0x4e   :  { %v169_v12 = vsel %vm161_vm1, %v3845_v9, 0  ;;  %v3846_v13 = vld [vmem:[#allocation2] ss:$12 sps:$4 sm:$0xff]   ;;  %v3849_v15 = vld [vmem:[#allocation2 + $0x18] ss:$12 sps:$4 sm:$0xff]   ;;  %v4559_v63 = vsub.s32 0, %v114_v62 }
  0x4f   :  { %v3854_v16 = vld [vmem:[#allocation2 + $0x34] ss:$12 sps:$4 sm:$0xff]   ;;  %v3852_v17 = vld [vmem:[#allocation2 + $0x30] ss:$12 sps:$4 sm:$0xff]   ;;  %v3857_v18 = vld [vmem:[#allocation2 + $0x4c] ss:$12 sps:$4 sm:$0xff]  }
  0x50   :  { %174 = vmatpush1.bf16.msra.mxu0 %v163_v7  ;;  %3699 = vmatpush3.bf16.msra.mxu1 %v169_v12  ;;  %v3855_v19 = vld [vmem:[#allocation2 + $0x48] ss:$12 sps:$4 sm:$0xff]   ;;  %v3860_v22 = vld [vmem:[#allocation2 + $0x64] ss:$12 sps:$4 sm:$0xff]   ;;  %v3878_v23 = vld [vmem:[#allocation2 + $0xe0] ss:$12 sps:$4 sm:$0xff]  }
  0x51   :  { %755 = vmatprep.subr.bf16.mxu0 %v3848_v11  ;;  %v3873_v20 = vld [vmem:[#allocation2 + $0xc8] ss:$12 sps:$4 sm:$0xff]   ;;  %v3879_v24 = vld [vmem:[#allocation2 + $0x20] ss:$12 sps:$4 sm:$0xff]   ;;  %v3883_v27 = vld [vmem:[#allocation2 + $0xf8] ss:$12 sps:$4 sm:$0xff]  }
  0x52   :  { %v3874_v21 = vld [vmem:[#allocation2 + $0x8] ss:$12 sps:$4 sm:$0xff]   ;;  %3541 = vmatprep.subr.bf16.mxu1 %v3873_v20  ;;  %v3858_v25 = vld [vmem:[#allocation2 + $0x60] ss:$12 sps:$4 sm:$0xff]   ;;  %v3884_v28 = vld [vmem:[#allocation2 + $0x38] ss:$12 sps:$4 sm:$0xff]  }
  0x53   :  { %3223 = vmatmul.mubr.msk.bf16.vlgmr.msra.gmra.mrb[0].mxu0 %vm157_vm2, %v102_v10  ;;  %3701 = vmatmul.mubr.msk.bf16.vlgmr.msra.gmra.mrb[0].mxu1 %vm157_vm2, %v102_v10  ;;  %v3863_v26 = vld [vmem:[#allocation2 + $0x7c] ss:$12 sps:$4 sm:$0xff]   ;;  %v3861_v29 = vld [vmem:[#allocation2 + $0x78] ss:$12 sps:$4 sm:$0xff]   ;;  %v3866_v30 = vld [vmem:[#allocation2 + $0x94] ss:$12 sps:$4 sm:$0xff]  }
  0x54   :  { %756 = vmatpush1.bf16.msra.mxu0 %v3846_v13  ;;  %3542 = vmatpush3.bf16.msra.mxu1 %v3874_v21  ;;  %v3888_v31 = vld [vmem:[#allocation2 + $0x110] ss:$12 sps:$4 sm:$0xff]   ;;  %v3893_v34 = vld [vmem:[#allocation2 + $0x128] ss:$12 sps:$4 sm:$0xff]   ;;  %v3869_v35 = vld [vmem:[#allocation2 + $0xac] ss:$12 sps:$4 sm:$0xff]  }
  0x55   :  { %757 = vmatprep.subr.bf16.mxu0 %v3851_v14  ;;  %3543 = vmatprep.subr.bf16.mxu1 %v3878_v23  ;;  %v3889_v32 = vld [vmem:[#allocation2 + $0x50] ss:$12 sps:$4 sm:$0xff]   ;;  %v3867_v36 = vld [vmem:[#allocation2 + $0xa8] ss:$12 sps:$4 sm:$0xff]   ;;  %v3898_v38 = vld [vmem:[#allocation2 + $0x140] ss:$12 sps:$4 sm:$0xff]  }
  0x56   :  { %v3864_v33 = vld [vmem:[#allocation2 + $0x90] ss:$12 sps:$4 sm:$0xff]   ;;  %v3894_v37 = vld [vmem:[#allocation2 + $0x68] ss:$12 sps:$4 sm:$0xff]   ;;  %v3899_v40 = vld [vmem:[#allocation2 + $0x80] ss:$12 sps:$4 sm:$0xff]  }
  0x57   :  { %v3872_v39 = vld [vmem:[#allocation2 + $0xc4] ss:$12 sps:$4 sm:$0xff]   ;;  %v3870_v41 = vld [vmem:[#allocation2 + $0xc0] ss:$12 sps:$4 sm:$0xff]   ;;  %v3877_v42 = vld [vmem:[#allocation2 + $0xdc] ss:$12 sps:$4 sm:$0xff]  }
  0x58   :  { %758 = vmatpush1.bf16.msra.mxu0 %v3849_v15  ;;  %3544 = vmatpush3.bf16.msra.mxu1 %v3879_v24  ;;  %v3875_v43 = vld [vmem:[#allocation2 + $0xd8] ss:$12 sps:$4 sm:$0xff]   ;;  %v3882_v44 = vld [vmem:[#allocation2 + $0xf4] ss:$12 sps:$4 sm:$0xff]   ;;  %v3880_v45 = vld [vmem:[#allocation2 + $0xf0] ss:$12 sps:$4 sm:$0xff]  }
  0x59   :  { %759 = vmatprep.subr.bf16.mxu0 %v3854_v16  ;;  %3545 = vmatprep.subr.bf16.mxu1 %v3883_v27  ;;  %v3887_v46 = vld [vmem:[#allocation2 + $0x10c] ss:$12 sps:$4 sm:$0xff]   ;;  %v3885_v47 = vld [vmem:[#allocation2 + $0x108] ss:$12 sps:$4 sm:$0xff]   ;;  %v3892_v48 = vld [vmem:[#allocation2 + $0x124] ss:$12 sps:$4 sm:$0xff]  }
  0x5a   :  { %v3890_v49 = vld [vmem:[#allocation2 + $0x120] ss:$12 sps:$4 sm:$0xff]   ;;  %v3897_v50 = vld [vmem:[#allocation2 + $0x13c] ss:$12 sps:$4 sm:$0xff]   ;;  %v3895_v51 = vld [vmem:[#allocation2 + $0x138] ss:$12 sps:$4 sm:$0xff]  }
  0x5b   :  { %v3902_v52 = vld [vmem:[#allocation2 + $0x154] ss:$12 sps:$4 sm:$0xff]   ;;  %v3903_v53 = vld [vmem:[#allocation2 + $0x158] ss:$12 sps:$4 sm:$0xff]   ;;  %v3900_v54 = vld [vmem:[#allocation2 + $0x150] ss:$12 sps:$4 sm:$0xff]  }
  0x5c   :  { %760 = vmatpush1.bf16.msra.mxu0 %v3852_v17  ;;  %3546 = vmatpush3.bf16.msra.mxu1 %v3884_v28  ;;  %v3904_v55 = vld [vmem:[#allocation2 + $0x98] ss:$12 sps:$4 sm:$0xff]   ;;  %v3908_v57 = vld [vmem:[#allocation2 + $0x170] ss:$12 sps:$4 sm:$0xff]   ;;  %v3905_v58 = vld [vmem:[#allocation2 + $0x168] ss:$12 sps:$4 sm:$0xff]  }
  0x5d   :  { %761 = vmatprep.subr.bf16.mxu0 %v3857_v18  ;;  %3547 = vmatprep.subr.bf16.mxu1 %v3888_v31  ;;  %v3907_v56 = vld [vmem:[#allocation2 + $0x16c] ss:$12 sps:$4 sm:$0xff]   ;;  %v3909_v59 = vld [vmem:[#allocation2 + $0xb0] ss:$12 sps:$4 sm:$0xff]   ;;  %v4564_v2 = vld [vmem:[%s4755_s2] sm:$0x7] }
  0x5e   :  { %v3912_v60 = vld [vmem:[#allocation2 + $0x184] ss:$12 sps:$4 sm:$0xff]   ;;  %v4566_v3 = vsub.s32 1, %v114_v62  ;;  %v116_v4 = vrot.slane %v4564_v2, %v4559_v63  ;;  %v3910_v18 = vld [vmem:[#allocation2 + $0x180] ss:$12 sps:$4 sm:$0xff]  }
  0x5f   :  { %v3914_v23 = vld [vmem:[#allocation2 + $0x198] ss:$12 sps:$4 sm:$0xff]   ;;  %v3917_v24 = vld [vmem:[#allocation2 + $0x1a0] ss:$12 sps:$4 sm:$0xff]   ;;  %v3960_v61 = vld [vmem:[#allocation5 + $0x90] ss:$12 sps:$4 sm:$0xff]  }
  0x60   :  { %762 = vmatpush1.bf16.msra.mxu0 %v3855_v19  ;;  %3548 = vmatpush3.bf16.msra.mxu1 %v3889_v32  ;;  %v120_v5 = vrot.slane %v4564_v2, %v4566_v3  ;;  %v3913_v19 = vld [vmem:[#allocation2 + $0x188] ss:$12 sps:$4 sm:$0xff]   ;;  %v3921_v27 = vld [vmem:[#allocation2 + $0x1b8] ss:$12 sps:$4 sm:$0xff]   ;;  %v4578_v32 = vsub.s32 2, %v114_v62 }
  0x61   :  { %763 = vmatprep.subr.bf16.mxu0 %v3860_v22  ;;  %3549 = vmatprep.subr.bf16.mxu1 %v3893_v34  ;;  %v3916_v22 = vld [vmem:[#allocation2 + $0x19c] ss:$12 sps:$4 sm:$0xff]   ;;  %v3924_v28 = vld [vmem:[#allocation2 + $0x1cc] ss:$12 sps:$4 sm:$0xff]   ;;  %v3928_v31 = vld [vmem:[#allocation2 + $0x1e4] ss:$12 sps:$4 sm:$0xff]  }
  0x62   :  { %v3929_v34 = vld [vmem:[#allocation2 + $0x1e8] ss:$12 sps:$4 sm:$0xff]   ;;  %v3965_v62 = vld [vmem:[#allocation5 + $0xac] ss:$12 sps:$4 sm:$0xff]  }
  0x64   :  { %764 = vmatpush1.bf16.msra.mxu0 %v3858_v25  ;;  %3550 = vmatpush3.bf16.msra.mxu1 %v3894_v37  ;;  %v3920_v25 = vld [vmem:[#allocation2 + $0x1b4] ss:$12 sps:$4 sm:$0xff]   ;;  %v3930_v37 = vld [vmem:[#allocation2 + $0x1f8] ss:$12 sps:$4 sm:$0xff]  }
  0x65   :  { %765 = vmatprep.subr.bf16.mxu0 %v3863_v26  ;;  %3551 = vmatprep.subr.bf16.mxu1 %v3898_v38  ;;  %v3918_v26 = vld [vmem:[#allocation2 + $0x1b0] ss:$12 sps:$4 sm:$0xff]   ;;  %v3933_v38 = vld [vmem:[#allocation2 + $0x200] ss:$12 sps:$4 sm:$0xff]  }
  0x68   :  { %766 = vmatpush1.bf16.msra.mxu0 %v3861_v29  ;;  %3552 = vmatpush3.bf16.msra.mxu1 %v3899_v40  ;;  %v3922_v29 = vld [vmem:[#allocation2 + $0x1c8] ss:$12 sps:$4 sm:$0xff]  }
  0x69   :  { %767 = vmatprep.subr.bf16.mxu0 %v3866_v30  ;;  %3553 = vmatprep.subr.bf16.mxu1 %v3903_v53  ;;  %v3925_v30 = vld [vmem:[#allocation2 + $0x1d0] ss:$12 sps:$4 sm:$0xff]  }
  0x6a   :  { %v3948_v53 = vld [vmem:[#allocation5 + $0x30] ss:$12 sps:$4 sm:$0xff]  }
  0x6c   :  { %768 = vmatpush1.bf16.msra.mxu0 %v3864_v33  ;;  %3554 = vmatpush3.bf16.msra.mxu1 %v3904_v55  ;;  %v3926_v33 = vld [vmem:[#allocation2 + $0x1e0] ss:$12 sps:$4 sm:$0xff]   ;;  %v3951_v55 = vld [vmem:[#allocation5 + $0x48] ss:$12 sps:$4 sm:$0xff]  }
  0x6d   :  { %769 = vmatprep.subr.bf16.mxu0 %v3869_v35  ;;  %3555 = vmatprep.subr.bf16.mxu1 %v3908_v57  ;;  %v3932_v35 = vld [vmem:[#allocation2 + $0x1fc] ss:$12 sps:$4 sm:$0xff]   ;;  %v3954_v57 = vld [vmem:[#allocation5 + $0x60] ss:$12 sps:$4 sm:$0xff]  }
  0x70   :  { %770 = vmatpush1.bf16.msra.mxu0 %v3867_v36  ;;  %3556 = vmatpush3.bf16.msra.mxu1 %v3909_v59  ;;  %v124_v36 = vrot.slane %v4564_v2, %v4578_v32  ;;  %v3957_v59 = vld [vmem:[#allocation5 + $0x78] ss:$12 sps:$4 sm:$0xff]   ;;  %v3963_v2 = vld [vmem:[#allocation5 + $0xa8] ss:$12 sps:$4 sm:$0xff]  }
  0x71   :  { %771 = vmatprep.subr.bf16.mxu0 %v3872_v39  ;;  %3704 = vmatprep.subr.bf16.mxu1 %v4380_v1  ;;  %v3936_v39 = vld [vmem:[#allocation2 + $0x214] ss:$12 sps:$4 sm:$0xff]  }
  0x74   :  { %772 = vmatpush1.bf16.msra.mxu0 %v3870_v41  ;;  %v3934_v41 = vld [vmem:[#allocation2 + $0x210] ss:$12 sps:$4 sm:$0xff]  }
  0x75   :  { %773 = vmatprep.subr.bf16.mxu0 %v3877_v42  ;;  %v3937_v42 = vld [vmem:[#allocation2 + $0x218] ss:$12 sps:$4 sm:$0xff]  }
  0x78   :  { %774 = vmatpush1.bf16.msra.mxu0 %v3875_v43  ;;  %v3940_v43 = vld [vmem:[#allocation2 + $0x22c] ss:$12 sps:$4 sm:$0xff]  }
  0x79   :  { %775 = vmatprep.subr.bf16.mxu0 %v3882_v44 }
  0x7c   :  { %776 = vmatpush1.bf16.msra.mxu0 %v3880_v45  ;;  %v3938_v45 = vld [vmem:[#allocation2 + $0x228] ss:$12 sps:$4 sm:$0xff]  }
  0x7d   :  { %777 = vmatprep.subr.bf16.mxu0 %v3887_v46  ;;  %v3941_v46 = vld [vmem:[#allocation2 + $0x230] ss:$12 sps:$4 sm:$0xff]  }
  0x80   :  { %778 = vmatpush1.bf16.msra.mxu0 %v3885_v47  ;;  %v3944_v47 = vld [vmem:[#allocation5 + $0x4] ss:$12 sps:$4 sm:$0xff]  }
  0x81   :  { %779 = vmatprep.subr.bf16.mxu0 %v3892_v48 }
  0x84   :  { %780 = vmatpush1.bf16.msra.mxu0 %v3890_v49  ;;  %v3942_v49 = vld [vmem:[#allocation5] ss:$12 sps:$4 sm:$0xff]  }
  0x85   :  { %781 = vmatprep.subr.bf16.mxu0 %v3897_v50  ;;  %v3947_v50 = vld [vmem:[#allocation5 + $0x1c] ss:$12 sps:$4 sm:$0xff]  }
  0x88   :  { %782 = vmatpush1.bf16.msra.mxu0 %v3895_v51  ;;  %v3945_v51 = vld [vmem:[#allocation5 + $0x18] ss:$12 sps:$4 sm:$0xff]  }
  0x89   :  { %783 = vmatprep.subr.bf16.mxu0 %v3902_v52  ;;  %v3950_v52 = vld [vmem:[#allocation5 + $0x34] ss:$12 sps:$4 sm:$0xff]  }
  0x8c   :  { %784 = vmatpush1.bf16.msra.mxu0 %v3900_v54  ;;  %v3953_v54 = vld [vmem:[#allocation5 + $0x4c] ss:$12 sps:$4 sm:$0xff]  }
  0x8d   :  { %785 = vmatprep.subr.bf16.mxu0 %v3907_v56  ;;  %v3956_v56 = vld [vmem:[#allocation5 + $0x64] ss:$12 sps:$4 sm:$0xff]  }
  0x90   :  { %786 = vmatpush1.bf16.msra.mxu0 %v3905_v58  ;;  %v3959_v58 = vld [vmem:[#allocation5 + $0x7c] ss:$12 sps:$4 sm:$0xff]  }
  0x91   :  { %796 = vmatprep.subr.bf16.mxu0 %v3912_v60  ;;  %v3962_v60 = vld [vmem:[#allocation5 + $0x94] ss:$12 sps:$4 sm:$0xff]  }
 0x126   :  { %v205_v6 = vpop.f32.mrb[0].mxu0  ;;  %v246_v13 = vpop.f32.mrb[0].mxu1 }
 0x127   :  { %v206_v7 = vadd.f32 %v205_v6, %v116_v4  ;;  %v207_v8 = vpop.f32.mrb[1].mxu0  ;;  %v3702_v15 = vpop.f32.mrb[1].mxu1  ;;  %v247_v40 = vadd.f32 %v246_v13, %v124_v36  ;;  %v3968_v4 = vld [vmem:[#allocation5 + $0xc4] ss:$12 sps:$4 sm:$0xff]   ;;  %v3970_v6 = vld [vmem:[#allocation5 + $0x8] ss:$12 sps:$4 sm:$0xff]  }
 0x128   :  { %v208_v9 = vadd.f32 %v207_v8, %v120_v5  ;;  %v209_v10 = vpop.f32.mrb[2].mxu0  ;;  %v249_v16 = vpop.f32.mrb[2].mxu1  ;;  %v3969_v5 = vld [vmem:[#allocation5 + $0xc8] ss:$12 sps:$4 sm:$0xff]   ;;  %v3974_v8 = vld [vmem:[#allocation5 + $0xe0] ss:$12 sps:$4 sm:$0xff]  }
 0x129   :  { %v252_v11 = vmax.f32 %v206_v7, 0.0  ;;  %v210_v12 = vpop.f32.mrb[3].mxu0  ;;  %v3703_v20 = vpop.f32.mrb[3].mxu1  ;;  %v254_v44 = vmax.f32 %v247_v40, 0.0  ;;  %v3966_v7 = vld [vmem:[#allocation5 + $0xc0] ss:$12 sps:$4 sm:$0xff]  }
 0x12a   :  { %v253_v14 = vmax.f32 %v208_v9, 0.0  ;;  %v3973_v9 = vld [vmem:[#allocation5 + $0xdc] ss:$12 sps:$4 sm:$0xff]   ;;  %v3975_v10 = vld [vmem:[#allocation5 + $0x20] ss:$12 sps:$4 sm:$0xff]  }
 0x12b   :  { %v255_v21 = vpack.c.bf16 %v252_v11, %v252_v11  ;;  %v257_v48 = vpack.c.bf16 %v254_v44, %v254_v44  ;;  %v3979_v11 = vld [vmem:[#allocation5 + $0xf8] ss:$12 sps:$4 sm:$0xff]   ;;  %v3978_v13 = vld [vmem:[#allocation5 + $0xf4] ss:$12 sps:$4 sm:$0xff]   ;;  %v3984_v15 = vld [vmem:[#allocation5 + $0x110] ss:$12 sps:$4 sm:$0xff]  }
 0x12c   :  { %v256_v17 = vpack.c.bf16 %v253_v14, %v253_v14  ;;  %v3971_v12 = vld [vmem:[#allocation5 + $0xd8] ss:$12 sps:$4 sm:$0xff]   ;;  %v3976_v16 = vld [vmem:[#allocation5 + $0xf0] ss:$12 sps:$4 sm:$0xff]   ;;  %v3981_v20 = vld [vmem:[#allocation5 + $0x108] ss:$12 sps:$4 sm:$0xff]  }
 0x12d   :  { %v3980_v14 = vld [vmem:[#allocation5 + $0x38] ss:$12 sps:$4 sm:$0xff]   ;;  %v4005_v36 = vld [vmem:[#allocation5 + $0xb0] ss:$12 sps:$4 sm:$0xff]  }
 0x12e   :  { %787 = vmatprep.mubr.bf16.mxu0 %v256_v17  ;;  %869 = vmatprep.mubr.bf16.mxu1 %v256_v17  ;;  %v3983_v17 = vld [vmem:[#allocation5 + $0x10c] ss:$12 sps:$4 sm:$0xff]  }
 0x12f   :  { %788 = vmatmul.mubr.bf16.vlgmr.msra.gmra.mrb[4].mxu0 %v255_v21  ;;  %870 = vmatmul.mubr.bf16.vlgmr.msra.gmra.mrb[4].mxu1 %v255_v21  ;;  %v3988_v21 = vld [vmem:[#allocation5 + $0x124] ss:$12 sps:$4 sm:$0xff]  }
 0x130   :  { %797 = vmatpush1.bf16.msra.mxu0 %v3910_v18  ;;  %3705 = vmatpush3.bf16.msra.mxu1 %v3913_v19  ;;  %v3985_v18 = vld [vmem:[#allocation5 + $0x50] ss:$12 sps:$4 sm:$0xff]   ;;  %v3989_v19 = vld [vmem:[#allocation5 + $0x128] ss:$12 sps:$4 sm:$0xff]  }
 0x131   :  { %798 = vmatprep.subr.bf16.mxu0 %v3916_v22  ;;  %3706 = vmatprep.subr.bf16.mxu1 %v4380_v1  ;;  %v3990_v22 = vld [vmem:[#allocation5 + $0x68] ss:$12 sps:$4 sm:$0xff]  }
 0x132   :  { %828 = vmatprep.mubr.bf16.mxu0 %v4379_v0  ;;  %3720 = vmatprep.mubr.msk.bf16.mxu1 %vm4381_vm0, %v4380_v1 }
 0x134   :  { %799 = vmatpush1.bf16.msra.mxu0 %v3914_v23  ;;  %3707 = vmatpush3.bf16.msra.mxu1 %v3917_v24  ;;  %v3994_v23 = vld [vmem:[#allocation5 + $0x140] ss:$12 sps:$4 sm:$0xff]  }
 0x135   :  { %800 = vmatprep.subr.bf16.mxu0 %v3920_v25  ;;  %3708 = vmatprep.subr.bf16.mxu1 %v4380_v1  ;;  %v3986_v24 = vld [vmem:[#allocation5 + $0x120] ss:$12 sps:$4 sm:$0xff]   ;;  %v3993_v25 = vld [vmem:[#allocation5 + $0x13c] ss:$12 sps:$4 sm:$0xff]  }
 0x138   :  { %801 = vmatpush1.bf16.msra.mxu0 %v3918_v26  ;;  %3709 = vmatpush3.bf16.msra.mxu1 %v3921_v27  ;;  %v3995_v26 = vld [vmem:[#allocation5 + $0x80] ss:$12 sps:$4 sm:$0xff]   ;;  %v3991_v27 = vld [vmem:[#allocation5 + $0x138] ss:$12 sps:$4 sm:$0xff]  }
 0x139   :  { %802 = vmatprep.subr.bf16.mxu0 %v3924_v28  ;;  %3710 = vmatprep.subr.bf16.mxu1 %v4380_v1  ;;  %v3998_v28 = vld [vmem:[#allocation5 + $0x154] ss:$12 sps:$4 sm:$0xff]  }
 0x13c   :  { %803 = vmatpush1.bf16.msra.mxu0 %v3922_v29  ;;  %3711 = vmatpush3.bf16.msra.mxu1 %v3925_v30  ;;  %v3999_v29 = vld [vmem:[#allocation5 + $0x158] ss:$12 sps:$4 sm:$0xff]   ;;  %v3996_v30 = vld [vmem:[#allocation5 + $0x150] ss:$12 sps:$4 sm:$0xff]  }
 0x13d   :  { %804 = vmatprep.subr.bf16.mxu0 %v3928_v31  ;;  %3712 = vmatprep.subr.bf16.mxu1 %v4380_v1  ;;  %v4000_v31 = vld [vmem:[#allocation5 + $0x98] ss:$12 sps:$4 sm:$0xff]  }
 0x140   :  { %805 = vmatpush1.bf16.msra.mxu0 %v3926_v33  ;;  %3713 = vmatpush3.bf16.msra.mxu1 %v3929_v34  ;;  %v4003_v33 = vld [vmem:[#allocation5 + $0x16c] ss:$12 sps:$4 sm:$0xff]   ;;  %v4004_v34 = vld [vmem:[#allocation5 + $0x170] ss:$12 sps:$4 sm:$0xff]  }
 0x141   :  { %806 = vmatprep.subr.bf16.mxu0 %v3932_v35  ;;  %3714 = vmatprep.subr.bf16.mxu1 %v4380_v1  ;;  %v4001_v35 = vld [vmem:[#allocation5 + $0x168] ss:$12 sps:$4 sm:$0xff]  }
 0x144   :  { %807 = vmatpush1.bf16.msra.mxu0 %v3930_v37  ;;  %3715 = vmatpush3.bf16.msra.mxu1 %v3933_v38  ;;  %v4008_v37 = vld [vmem:[#allocation5 + $0x184] ss:$12 sps:$4 sm:$0xff]  }
 0x145   :  { %808 = vmatprep.subr.bf16.mxu0 %v3936_v39  ;;  %3716 = vmatprep.subr.bf16.mxu1 %v4380_v1 }
 0x148   :  { %809 = vmatpush1.bf16.msra.mxu0 %v3934_v41  ;;  %3717 = vmatpush3.bf16.msra.mxu1 %v3937_v42 }
 0x149   :  { %810 = vmatprep.subr.bf16.mxu0 %v3940_v43  ;;  %3718 = vmatprep.subr.bf16.mxu1 %v4380_v1  ;;  %v354_v43 = vld [vmem:[%s4757_s4] sm:$0x7] }
 0x14a   :  { %v367_v44 = vrot.slane %v354_v43, %v4578_v32 }
 0x14c   :  { %811 = vmatpush1.bf16.msra.mxu0 %v3938_v45  ;;  %3719 = vmatpush3.bf16.msra.mxu1 %v3941_v46  ;;  %v359_v45 = vrot.slane %v354_v43, %v4559_v63  ;;  %v363_v46 = vrot.slane %v354_v43, %v4566_v3  ;;  %v4061_v43 = vld [vmem:[#allocation7 + $0xac] ss:$12 sps:$4 sm:$0xff]  }
 0x14d   :  { %1420 = vmatprep.subr.bf16.mxu1 %v3944_v47  ;;  %3572 = vmatprep.subr.bf16.mxu0 %v3969_v5  ;;  %v4012_v5 = vld [vmem:[#allocation5 + $0x19c] ss:$12 sps:$4 sm:$0xff]  }
 0x14f   :  { %829 = vmatmul.mubr.bf16.vlgmr.msra.gmra.mrb[4].mxu0 %v257_v48  ;;  %3721 = vmatmul.mubr.bf16.vlgmr.msra.gmra.mrb[8].mxu1 %v257_v48 }
 0x150   :  { %1421 = vmatpush1.bf16.msra.mxu1 %v3942_v49  ;;  %3573 = vmatpush3.bf16.msra.mxu0 %v3970_v6  ;;  %v4010_v6 = vld [vmem:[#allocation5 + $0x198] ss:$12 sps:$4 sm:$0xff]  }
 0x151   :  { %1422 = vmatprep.subr.bf16.mxu1 %v3947_v50  ;;  %3574 = vmatprep.subr.bf16.mxu0 %v3974_v8  ;;  %v4016_v8 = vld [vmem:[#allocation5 + $0x1b4] ss:$12 sps:$4 sm:$0xff]  }
 0x154   :  { %1423 = vmatpush1.bf16.msra.mxu1 %v3945_v51  ;;  %3575 = vmatpush3.bf16.msra.mxu0 %v3975_v10  ;;  %v4017_v10 = vld [vmem:[#allocation5 + $0x1b8] ss:$12 sps:$4 sm:$0xff]  }
 0x155   :  { %1424 = vmatprep.subr.bf16.mxu1 %v3950_v52  ;;  %3576 = vmatprep.subr.bf16.mxu0 %v3979_v11  ;;  %v4020_v11 = vld [vmem:[#allocation5 + $0x1cc] ss:$12 sps:$4 sm:$0xff]  }
 0x158   :  { %1425 = vmatpush1.bf16.msra.mxu1 %v3948_v53  ;;  %3577 = vmatpush3.bf16.msra.mxu0 %v3980_v14  ;;  %v4024_v14 = vld [vmem:[#allocation5 + $0x1e4] ss:$12 sps:$4 sm:$0xff]  }
 0x159   :  { %1426 = vmatprep.subr.bf16.mxu1 %v3953_v54  ;;  %3578 = vmatprep.subr.bf16.mxu0 %v3984_v15  ;;  %v4022_v15 = vld [vmem:[#allocation5 + $0x1e0] ss:$12 sps:$4 sm:$0xff]  }
 0x15c   :  { %1427 = vmatpush1.bf16.msra.mxu1 %v3951_v55  ;;  %3579 = vmatpush3.bf16.msra.mxu0 %v3985_v18  ;;  %v4026_v18 = vld [vmem:[#allocation5 + $0x1f8] ss:$12 sps:$4 sm:$0xff]  }
 0x15d   :  { %1428 = vmatprep.subr.bf16.mxu1 %v3956_v56  ;;  %3580 = vmatprep.subr.bf16.mxu0 %v3989_v19  ;;  %v4029_v19 = vld [vmem:[#allocation5 + $0x200] ss:$12 sps:$4 sm:$0xff]  }
 0x160   :  { %1429 = vmatpush1.bf16.msra.mxu1 %v3954_v57  ;;  %3581 = vmatpush3.bf16.msra.mxu0 %v3990_v22  ;;  %v4033_v22 = vld [vmem:[#allocation5 + $0x218] ss:$12 sps:$4 sm:$0xff]  }
 0x161   :  { %1430 = vmatprep.subr.bf16.mxu1 %v3959_v58  ;;  %3582 = vmatprep.subr.bf16.mxu0 %v3994_v23  ;;  %v4036_v23 = vld [vmem:[#allocation5 + $0x22c] ss:$12 sps:$4 sm:$0xff]  }
 0x164   :  { %1431 = vmatpush1.bf16.msra.mxu1 %v3957_v59  ;;  %3583 = vmatpush3.bf16.msra.mxu0 %v3995_v26 }
 0x165   :  { %1432 = vmatprep.subr.bf16.mxu1 %v3962_v60  ;;  %3584 = vmatprep.subr.bf16.mxu0 %v3999_v29 }
 0x168   :  { %1433 = vmatpush1.bf16.msra.mxu1 %v3960_v61  ;;  %3585 = vmatpush3.bf16.msra.mxu0 %v4000_v31  ;;  %v4041_v31 = vld [vmem:[#allocation7 + $0x18] ss:$12 sps:$4 sm:$0xff]  }
 0x169   :  { %1434 = vmatprep.subr.bf16.mxu1 %v3965_v62  ;;  %3586 = vmatprep.subr.bf16.mxu0 %v4004_v34  ;;  %v4006_v62 = vld [vmem:[#allocation5 + $0x180] ss:$12 sps:$4 sm:$0xff]   ;;  %v4044_v34 = vld [vmem:[#allocation7 + $0x30] ss:$12 sps:$4 sm:$0xff]  }
 0x16c   :  { %1435 = vmatpush1.bf16.msra.mxu1 %v3963_v2  ;;  %3587 = vmatpush3.bf16.msra.mxu0 %v4005_v36  ;;  %v4009_v2 = vld [vmem:[#allocation5 + $0x188] ss:$12 sps:$4 sm:$0xff]  }
 0x16d   :  { %1436 = vmatprep.subr.bf16.mxu1 %v3968_v4  ;;  %3724 = vmatprep.subr.bf16.mxu0 %v4380_v1  ;;  %v4047_v36 = vld [vmem:[#allocation7 + $0x48] ss:$12 sps:$4 sm:$0xff]  }
 0x170   :  { %1437 = vmatpush1.bf16.msra.mxu1 %v3966_v7  ;;  %v4013_v7 = vld [vmem:[#allocation5 + $0x1a0] ss:$12 sps:$4 sm:$0xff]  }
 0x171   :  { %1438 = vmatprep.subr.bf16.mxu1 %v3973_v9  ;;  %v4014_v9 = vld [vmem:[#allocation5 + $0x1b0] ss:$12 sps:$4 sm:$0xff]  }
 0x174   :  { %1439 = vmatpush1.bf16.msra.mxu1 %v3971_v12  ;;  %v4018_v12 = vld [vmem:[#allocation5 + $0x1c8] ss:$12 sps:$4 sm:$0xff]  }
 0x175   :  { %1440 = vmatprep.subr.bf16.mxu1 %v3978_v13  ;;  %v4021_v13 = vld [vmem:[#allocation5 + $0x1d0] ss:$12 sps:$4 sm:$0xff]  }
 0x178   :  { %1441 = vmatpush1.bf16.msra.mxu1 %v3976_v16  ;;  %v4025_v16 = vld [vmem:[#allocation5 + $0x1e8] ss:$12 sps:$4 sm:$0xff]  }
 0x179   :  { %1442 = vmatprep.subr.bf16.mxu1 %v3983_v17  ;;  %v4028_v17 = vld [vmem:[#allocation5 + $0x1fc] ss:$12 sps:$4 sm:$0xff]  }
 0x17c   :  { %1443 = vmatpush1.bf16.msra.mxu1 %v3981_v20  ;;  %v4032_v20 = vld [vmem:[#allocation5 + $0x214] ss:$12 sps:$4 sm:$0xff]  }
 0x17d   :  { %1444 = vmatprep.subr.bf16.mxu1 %v3988_v21  ;;  %v4030_v21 = vld [vmem:[#allocation5 + $0x210] ss:$12 sps:$4 sm:$0xff]  }
 0x180   :  { %1445 = vmatpush1.bf16.msra.mxu1 %v3986_v24  ;;  %v4034_v24 = vld [vmem:[#allocation5 + $0x228] ss:$12 sps:$4 sm:$0xff]  }
 0x181   :  { %1446 = vmatprep.subr.bf16.mxu1 %v3993_v25  ;;  %v4037_v25 = vld [vmem:[#allocation5 + $0x230] ss:$12 sps:$4 sm:$0xff]  }
 0x184   :  { %1447 = vmatpush1.bf16.msra.mxu1 %v3991_v27  ;;  %v4040_v27 = vld [vmem:[#allocation7 + $0x4] ss:$12 sps:$4 sm:$0xff]  }
 0x185   :  { %1448 = vmatprep.subr.bf16.mxu1 %v3998_v28  ;;  %v4038_v28 = vld [vmem:[#allocation7] ss:$12 sps:$4 sm:$0xff]  }
 0x188   :  { %1449 = vmatpush1.bf16.msra.mxu1 %v3996_v30  ;;  %v4043_v30 = vld [vmem:[#allocation7 + $0x1c] ss:$12 sps:$4 sm:$0xff]  }
 0x189   :  { %1450 = vmatprep.subr.bf16.mxu1 %v4003_v33  ;;  %v4046_v33 = vld [vmem:[#allocation7 + $0x34] ss:$12 sps:$4 sm:$0xff]  }
 0x18c   :  { %1451 = vmatpush1.bf16.msra.mxu1 %v4001_v35  ;;  %v4049_v35 = vld [vmem:[#allocation7 + $0x4c] ss:$12 sps:$4 sm:$0xff]  }
 0x18d   :  { %1461 = vmatprep.subr.bf16.mxu1 %v4008_v37  ;;  %v4052_v37 = vld [vmem:[#allocation7 + $0x64] ss:$12 sps:$4 sm:$0xff]  }
 0x202   :  { %v3557_v38 = vpop.f32.mrb[4].mxu1 }
 0x203   :  { %v3558_v39 = vpop.f32.mrb[5].mxu1 }
 0x204   :  { %v3559_v40 = vadd.f32 %v3558_v39, %v3557_v38  ;;  %v3560_v41 = vpop.f32.mrb[6].mxu1  ;;  %v4050_v38 = vld [vmem:[#allocation7 + $0x60] ss:$12 sps:$4 sm:$0xff]   ;;  %v4055_v39 = vld [vmem:[#allocation7 + $0x7c] ss:$12 sps:$4 sm:$0xff]  }
 0x205   :  { %v3561_v42 = vpop.f32.mrb[7].mxu1  ;;  %v4058_v41 = vld [vmem:[#allocation7 + $0x94] ss:$12 sps:$4 sm:$0xff]  }
 0x206   :  { %v872_v47 = vadd.f32 %v3559_v40, %v367_v44  ;;  %v4053_v40 = vld [vmem:[#allocation7 + $0x78] ss:$12 sps:$4 sm:$0xff]   ;;  %v4056_v42 = vld [vmem:[#allocation7 + $0x90] ss:$12 sps:$4 sm:$0xff]   ;;  %v4059_v44 = vld [vmem:[#allocation7 + $0xa8] ss:$12 sps:$4 sm:$0xff]  }
 0x222   :  { %v830_v48 = vpop.f32.mrb[4].mxu0  ;;  %v911_v49 = vpop.f32.mrb[8].mxu1 }
 0x223   :  { %v3804_v50 = vadd.f32 %v830_v48, %v359_v45  ;;  %v4593_v51 = vadd.f32 %v911_v49, %v872_v47  ;;  %v832_v52 = vpop.f32.mrb[5].mxu0  ;;  %v3722_v53 = vpop.f32.mrb[9].mxu1  ;;  %v4064_v45 = vld [vmem:[#allocation7 + $0xc4] ss:$12 sps:$4 sm:$0xff]   ;;  %v4066_v47 = vld [vmem:[#allocation7 + $0x8] ss:$12 sps:$4 sm:$0xff]  }
 0x224   :  { %v3805_v54 = vadd.f32 %v832_v52, %v363_v46  ;;  %v834_v55 = vpop.f32.mrb[6].mxu0  ;;  %v914_v56 = vpop.f32.mrb[10].mxu1  ;;  %v4065_v46 = vld [vmem:[#allocation7 + $0xc8] ss:$12 sps:$4 sm:$0xff]   ;;  %v4062_v48 = vld [vmem:[#allocation7 + $0xc0] ss:$12 sps:$4 sm:$0xff]  }
 0x225   :  { %v917_v57 = vmax.f32 %v3804_v50, 0.0  ;;  %v835_v58 = vpop.f32.mrb[7].mxu0  ;;  %v3723_v59 = vpop.f32.mrb[11].mxu1  ;;  %v919_v26 = vmax.f32 %v4593_v51, 0.0  ;;  %v4070_v49 = vld [vmem:[#allocation7 + $0xe0] ss:$12 sps:$4 sm:$0xff]  }
 0x226   :  { %v918_v60 = vmax.f32 %v3805_v54, 0.0  ;;  %v4069_v50 = vld [vmem:[#allocation7 + $0xdc] ss:$12 sps:$4 sm:$0xff]   ;;  %v4071_v51 = vld [vmem:[#allocation7 + $0x20] ss:$12 sps:$4 sm:$0xff]  }
 0x227   :  { %v920_v4 = vpack.c.bf16 %v917_v57, %v917_v57  ;;  %v922_v29 = vpack.c.bf16 %v919_v26, %v919_v26  ;;  %v4075_v52 = vld [vmem:[#allocation7 + $0xf8] ss:$12 sps:$4 sm:$0xff]   ;;  %v4074_v54 = vld [vmem:[#allocation7 + $0xf4] ss:$12 sps:$4 sm:$0xff]   ;;  %v4080_v56 = vld [vmem:[#allocation7 + $0x110] ss:$12 sps:$4 sm:$0xff]  }
 0x228   :  { %v921_v61 = vpack.c.bf16 %v918_v60, %v918_v60  ;;  %v4067_v53 = vld [vmem:[#allocation7 + $0xd8] ss:$12 sps:$4 sm:$0xff]   ;;  %v4072_v57 = vld [vmem:[#allocation7 + $0xf0] ss:$12 sps:$4 sm:$0xff]   ;;  %v4085_v60 = vld [vmem:[#allocation7 + $0x128] ss:$12 sps:$4 sm:$0xff]  }
 0x229   :  { %v4076_v55 = vld [vmem:[#allocation7 + $0x38] ss:$12 sps:$4 sm:$0xff]   ;;  %v4081_v59 = vld [vmem:[#allocation7 + $0x50] ss:$12 sps:$4 sm:$0xff]  }
 0x22a   :  { %1452 = vmatprep.mubr.bf16.mxu1 %v921_v61  ;;  %1534 = vmatprep.mubr.bf16.mxu0 %v921_v61  ;;  %v4079_v58 = vld [vmem:[#allocation7 + $0x10c] ss:$12 sps:$4 sm:$0xff]   ;;  %v4077_v61 = vld [vmem:[#allocation7 + $0x108] ss:$12 sps:$4 sm:$0xff]  }
 0x22b   :  { %1453 = vmatmul.mubr.bf16.vlgmr.msra.gmra.mrb[12].mxu1 %v920_v4  ;;  %1535 = vmatmul.mubr.bf16.vlgmr.msra.gmra.mrb[8].mxu0 %v920_v4  ;;  %v4090_v4 = vld [vmem:[#allocation7 + $0x140] ss:$12 sps:$4 sm:$0xff]  }
 0x22c   :  { %1462 = vmatpush1.bf16.msra.mxu1 %v4006_v62  ;;  %3725 = vmatpush3.bf16.msra.mxu0 %v4009_v2  ;;  %v4084_v62 = vld [vmem:[#allocation7 + $0x124] ss:$12 sps:$4 sm:$0xff]   ;;  %v4086_v2 = vld [vmem:[#allocation7 + $0x68] ss:$12 sps:$4 sm:$0xff]  }
 0x22d   :  { %1463 = vmatprep.subr.bf16.mxu1 %v4012_v5  ;;  %3726 = vmatprep.subr.bf16.mxu0 %v4380_v1  ;;  %v4082_v5 = vld [vmem:[#allocation7 + $0x120] ss:$12 sps:$4 sm:$0xff]  }
 0x22e   :  { %1493 = vmatprep.mubr.bf16.mxu1 %v4379_v0  ;;  %3740 = vmatprep.mubr.msk.bf16.mxu0 %vm4381_vm0, %v4380_v1 }
 0x230   :  { %1464 = vmatpush1.bf16.msra.mxu1 %v4010_v6  ;;  %3727 = vmatpush3.bf16.msra.mxu0 %v4013_v7  ;;  %v4089_v6 = vld [vmem:[#allocation7 + $0x13c] ss:$12 sps:$4 sm:$0xff]   ;;  %v4091_v7 = vld [vmem:[#allocation7 + $0x80] ss:$12 sps:$4 sm:$0xff]  }
 0x231   :  { %1465 = vmatprep.subr.bf16.mxu1 %v4016_v8  ;;  %3728 = vmatprep.subr.bf16.mxu0 %v4380_v1  ;;  %v4087_v8 = vld [vmem:[#allocation7 + $0x138] ss:$12 sps:$4 sm:$0xff]  }
 0x234   :  { %1466 = vmatpush1.bf16.msra.mxu1 %v4014_v9  ;;  %3729 = vmatpush3.bf16.msra.mxu0 %v4017_v10  ;;  %v4094_v9 = vld [vmem:[#allocation7 + $0x154] ss:$12 sps:$4 sm:$0xff]   ;;  %v4095_v10 = vld [vmem:[#allocation7 + $0x158] ss:$12 sps:$4 sm:$0xff]  }
 0x235   :  { %1467 = vmatprep.subr.bf16.mxu1 %v4020_v11  ;;  %3730 = vmatprep.subr.bf16.mxu0 %v4380_v1  ;;  %v4092_v11 = vld [vmem:[#allocation7 + $0x150] ss:$12 sps:$4 sm:$0xff]  }
 0x238   :  { %1468 = vmatpush1.bf16.msra.mxu1 %v4018_v12  ;;  %3731 = vmatpush3.bf16.msra.mxu0 %v4021_v13  ;;  %v4096_v12 = vld [vmem:[#allocation7 + $0x98] ss:$12 sps:$4 sm:$0xff]  }
 0x239   :  { %1469 = vmatprep.subr.bf16.mxu1 %v4024_v14  ;;  %3732 = vmatprep.subr.bf16.mxu0 %v4380_v1  ;;  %v4099_v13 = vld [vmem:[#allocation7 + $0x16c] ss:$12 sps:$4 sm:$0xff]   ;;  %v4100_v14 = vld [vmem:[#allocation7 + $0x170] ss:$12 sps:$4 sm:$0xff]  }
 0x23c   :  { %1470 = vmatpush1.bf16.msra.mxu1 %v4022_v15  ;;  %3733 = vmatpush3.bf16.msra.mxu0 %v4025_v16  ;;  %v4097_v15 = vld [vmem:[#allocation7 + $0x168] ss:$12 sps:$4 sm:$0xff]   ;;  %v4101_v16 = vld [vmem:[#allocation7 + $0xb0] ss:$12 sps:$4 sm:$0xff]  }
 0x23d   :  { %1471 = vmatprep.subr.bf16.mxu1 %v4028_v17  ;;  %3734 = vmatprep.subr.bf16.mxu0 %v4380_v1  ;;  %v4104_v17 = vld [vmem:[#allocation7 + $0x184] ss:$12 sps:$4 sm:$0xff]  }
 0x240   :  { %1472 = vmatpush1.bf16.msra.mxu1 %v4026_v18  ;;  %3735 = vmatpush3.bf16.msra.mxu0 %v4029_v19 }
 0x241   :  { %1473 = vmatprep.subr.bf16.mxu1 %v4032_v20  ;;  %3736 = vmatprep.subr.bf16.mxu0 %v4380_v1 }
 0x244   :  { %1474 = vmatpush1.bf16.msra.mxu1 %v4030_v21  ;;  %3737 = vmatpush3.bf16.msra.mxu0 %v4033_v22 }
 0x245   :  { %1475 = vmatprep.subr.bf16.mxu1 %v4036_v23  ;;  %3738 = vmatprep.subr.bf16.mxu0 %v4380_v1  ;;  %v1019_v23 = vld [vmem:[%s4759_s6] sm:$0x7]  ;;  %s4382_s6 = smov [#allocation10]  }
 0x246   :  { %v1028_v26 = vrot.slane %v1019_v23, %v4566_v3  ;;  %s3205_s24 = sshll.u32 %s4382_s6, 4  ;;  %s3206_s24 = int_to_ptr.vmem [resolvable:$true] %s3205_s24 }
 0x247   :  { %s4343_s7 = scalar_lea.vmem %s3206_s24, 128  ;;  %p4348_p5 = scmp.lt.s32.totalorder %s3206_s24, %s3206_s24 }
 0x248   :  { %1476 = vmatpush1.bf16.msra.mxu1 %v4034_v24  ;;  %3739 = vmatpush3.bf16.msra.mxu0 %v4037_v25  ;;  %v1032_v24 = vrot.slane %v1019_v23, %v4578_v32  ;;  %v1024_v25 = vrot.slane %v1019_v23, %v4559_v63  ;;  %v4157_v23 = vld [vmem:[#allocation8 + $0xac] ss:$12 sps:$4 sm:$0xff]   ;;  %p4344_p4 = scmp.ne.s32.totalorder %s3206_s24, %s4343_s7  ;;  %p4349_p6 = scmp.lt.s32.totalorder %s4343_s7, %s4343_s7 }
 0x249   :  { %2085 = vmatprep.subr.bf16.mxu0 %v4040_v27  ;;  %3603 = vmatprep.subr.bf16.mxu1 %v4065_v46  ;;  %v4108_v46 = vld [vmem:[#allocation7 + $0x19c] ss:$12 sps:$4 sm:$0xff]  }
 0x24a   :  { %p4350_p7 = por %p4349_p6, %p4348_p5 }
 0x24b   :  { %1494 = vmatmul.mubr.bf16.vlgmr.msra.gmra.mrb[12].mxu1 %v922_v29  ;;  %3741 = vmatmul.mubr.bf16.vlgmr.msra.gmra.mrb[12].mxu0 %v922_v29 }
 0x24c   :  { %2086 = vmatpush1.bf16.msra.mxu0 %v4038_v28  ;;  %3604 = vmatpush3.bf16.msra.mxu1 %v4066_v47  ;;  %v4106_v47 = vld [vmem:[#allocation7 + $0x198] ss:$12 sps:$4 sm:$0xff]   ;;  %p4351_p8 = pnand %p4350_p7, %p4344_p4 }
 0x24d   :  { %2087 = vmatprep.subr.bf16.mxu0 %v4043_v30  ;;  %3605 = vmatprep.subr.bf16.mxu1 %v4070_v49  ;;  %v4112_v49 = vld [vmem:[#allocation7 + $0x1b4] ss:$12 sps:$4 sm:$0xff]  }
 0x250   :  { %2088 = vmatpush1.bf16.msra.mxu0 %v4041_v31  ;;  %3606 = vmatpush3.bf16.msra.mxu1 %v4071_v51  ;;  %v4113_v51 = vld [vmem:[#allocation7 + $0x1b8] ss:$12 sps:$4 sm:$0xff]  }
 0x251   :  { %2089 = vmatprep.subr.bf16.mxu0 %v4046_v33  ;;  %3607 = vmatprep.subr.bf16.mxu1 %v4075_v52  ;;  %v4116_v52 = vld [vmem:[#allocation7 + $0x1cc] ss:$12 sps:$4 sm:$0xff]  }
 0x254   :  { %2090 = vmatpush1.bf16.msra.mxu0 %v4044_v34  ;;  %3608 = vmatpush3.bf16.msra.mxu1 %v4076_v55  ;;  %v4120_v55 = vld [vmem:[#allocation7 + $0x1e4] ss:$12 sps:$4 sm:$0xff]  }
 0x255   :  { %2091 = vmatprep.subr.bf16.mxu0 %v4049_v35  ;;  %3609 = vmatprep.subr.bf16.mxu1 %v4080_v56  ;;  %v4118_v56 = vld [vmem:[#allocation7 + $0x1e0] ss:$12 sps:$4 sm:$0xff]  }
 0x258   :  { %2092 = vmatpush1.bf16.msra.mxu0 %v4047_v36  ;;  %3610 = vmatpush3.bf16.msra.mxu1 %v4081_v59  ;;  %v4122_v59 = vld [vmem:[#allocation7 + $0x1f8] ss:$12 sps:$4 sm:$0xff]  }
 0x259   :  { %2093 = vmatprep.subr.bf16.mxu0 %v4052_v37  ;;  %3611 = vmatprep.subr.bf16.mxu1 %v4085_v60  ;;  %v4125_v60 = vld [vmem:[#allocation7 + $0x200] ss:$12 sps:$4 sm:$0xff]  }
 0x25c   :  { %2094 = vmatpush1.bf16.msra.mxu0 %v4050_v38  ;;  %3612 = vmatpush3.bf16.msra.mxu1 %v4086_v2  ;;  %v4129_v2 = vld [vmem:[#allocation7 + $0x218] ss:$12 sps:$4 sm:$0xff]  }
 0x25d   :  { %2095 = vmatprep.subr.bf16.mxu0 %v4055_v39  ;;  %3613 = vmatprep.subr.bf16.mxu1 %v4090_v4  ;;  %v4132_v4 = vld [vmem:[#allocation7 + $0x22c] ss:$12 sps:$4 sm:$0xff]  }
 0x260   :  { %2096 = vmatpush1.bf16.msra.mxu0 %v4053_v40  ;;  %3614 = vmatpush3.bf16.msra.mxu1 %v4091_v7 }
 0x261   :  { %2097 = vmatprep.subr.bf16.mxu0 %v4058_v41  ;;  %3615 = vmatprep.subr.bf16.mxu1 %v4095_v10 }
 0x264   :  { %2098 = vmatpush1.bf16.msra.mxu0 %v4056_v42  ;;  %3616 = vmatpush3.bf16.msra.mxu1 %v4096_v12  ;;  %v4137_v12 = vld [vmem:[#allocation8 + $0x18] ss:$12 sps:$4 sm:$0xff]  }
 0x265   :  { %2099 = vmatprep.subr.bf16.mxu0 %v4061_v43  ;;  %3617 = vmatprep.subr.bf16.mxu1 %v4100_v14  ;;  %v4102_v43 = vld [vmem:[#allocation7 + $0x180] ss:$12 sps:$4 sm:$0xff]   ;;  %v4140_v14 = vld [vmem:[#allocation8 + $0x30] ss:$12 sps:$4 sm:$0xff]  }
 0x268   :  { %2100 = vmatpush1.bf16.msra.mxu0 %v4059_v44  ;;  %3618 = vmatpush3.bf16.msra.mxu1 %v4101_v16  ;;  %v4105_v44 = vld [vmem:[#allocation7 + $0x188] ss:$12 sps:$4 sm:$0xff]  }
 0x269   :  { %2101 = vmatprep.subr.bf16.mxu0 %v4064_v45  ;;  %3744 = vmatprep.subr.bf16.mxu1 %v4380_v1  ;;  %v4143_v16 = vld [vmem:[#allocation8 + $0x48] ss:$12 sps:$4 sm:$0xff]  }
 0x26c   :  { %2102 = vmatpush1.bf16.msra.mxu0 %v4062_v48  ;;  %v4109_v48 = vld [vmem:[#allocation7 + $0x1a0] ss:$12 sps:$4 sm:$0xff]  }
 0x26d   :  { %2103 = vmatprep.subr.bf16.mxu0 %v4069_v50  ;;  %v4110_v50 = vld [vmem:[#allocation7 + $0x1b0] ss:$12 sps:$4 sm:$0xff]  }
 0x270   :  { %2104 = vmatpush1.bf16.msra.mxu0 %v4067_v53  ;;  %v4114_v53 = vld [vmem:[#allocation7 + $0x1c8] ss:$12 sps:$4 sm:$0xff]  }
 0x271   :  { %2105 = vmatprep.subr.bf16.mxu0 %v4074_v54  ;;  %v4117_v54 = vld [vmem:[#allocation7 + $0x1d0] ss:$12 sps:$4 sm:$0xff]  }
 0x274   :  { %2106 = vmatpush1.bf16.msra.mxu0 %v4072_v57  ;;  %v4121_v57 = vld [vmem:[#allocation7 + $0x1e8] ss:$12 sps:$4 sm:$0xff]  }
 0x275   :  { %2107 = vmatprep.subr.bf16.mxu0 %v4079_v58  ;;  %v4124_v58 = vld [vmem:[#allocation7 + $0x1fc] ss:$12 sps:$4 sm:$0xff]  }
 0x278   :  { %2108 = vmatpush1.bf16.msra.mxu0 %v4077_v61  ;;  %v4128_v61 = vld [vmem:[#allocation7 + $0x214] ss:$12 sps:$4 sm:$0xff]  }
 0x279   :  { %2109 = vmatprep.subr.bf16.mxu0 %v4084_v62  ;;  %v4126_v62 = vld [vmem:[#allocation7 + $0x210] ss:$12 sps:$4 sm:$0xff]  }
 0x27c   :  { %2110 = vmatpush1.bf16.msra.mxu0 %v4082_v5  ;;  %v4130_v5 = vld [vmem:[#allocation7 + $0x228] ss:$12 sps:$4 sm:$0xff]  }
 0x27d   :  { %2111 = vmatprep.subr.bf16.mxu0 %v4089_v6  ;;  %v4133_v6 = vld [vmem:[#allocation7 + $0x230] ss:$12 sps:$4 sm:$0xff]  }
 0x280   :  { %2112 = vmatpush1.bf16.msra.mxu0 %v4087_v8  ;;  %v4136_v8 = vld [vmem:[#allocation8 + $0x4] ss:$12 sps:$4 sm:$0xff]  }
 0x281   :  { %2113 = vmatprep.subr.bf16.mxu0 %v4094_v9  ;;  %v4134_v9 = vld [vmem:[#allocation8] ss:$12 sps:$4 sm:$0xff]  }
 0x284   :  { %2114 = vmatpush1.bf16.msra.mxu0 %v4092_v11  ;;  %v4139_v11 = vld [vmem:[#allocation8 + $0x1c] ss:$12 sps:$4 sm:$0xff]  }
 0x285   :  { %2115 = vmatprep.subr.bf16.mxu0 %v4099_v13  ;;  %v4142_v13 = vld [vmem:[#allocation8 + $0x34] ss:$12 sps:$4 sm:$0xff]  }
 0x288   :  { %2116 = vmatpush1.bf16.msra.mxu0 %v4097_v15  ;;  %v4145_v15 = vld [vmem:[#allocation8 + $0x4c] ss:$12 sps:$4 sm:$0xff]  }
 0x289   :  { %2126 = vmatprep.subr.bf16.mxu0 %v4104_v17  ;;  %v4148_v17 = vld [vmem:[#allocation8 + $0x64] ss:$12 sps:$4 sm:$0xff]  }
 0x2fe   :  { %v3588_v18 = vpop.f32.mrb[8].mxu0 }
 0x2ff   :  { %v3589_v19 = vpop.f32.mrb[9].mxu0 }
 0x300   :  { %v3590_v20 = vadd.f32 %v3589_v19, %v3588_v18  ;;  %v3591_v21 = vpop.f32.mrb[10].mxu0  ;;  %v4146_v18 = vld [vmem:[#allocation8 + $0x60] ss:$12 sps:$4 sm:$0xff]   ;;  %v4151_v19 = vld [vmem:[#allocation8 + $0x7c] ss:$12 sps:$4 sm:$0xff]  }
 0x301   :  { %v3592_v22 = vpop.f32.mrb[11].mxu0  ;;  %v4154_v21 = vld [vmem:[#allocation8 + $0x94] ss:$12 sps:$4 sm:$0xff]  }
 0x302   :  { %v1537_v27 = vadd.f32 %v3590_v20, %v1032_v24  ;;  %v4149_v20 = vld [vmem:[#allocation8 + $0x78] ss:$12 sps:$4 sm:$0xff]   ;;  %v4152_v22 = vld [vmem:[#allocation8 + $0x90] ss:$12 sps:$4 sm:$0xff]   ;;  %v4155_v24 = vld [vmem:[#allocation8 + $0xa8] ss:$12 sps:$4 sm:$0xff]  }
 0x31e   :  { %v1495_v28 = vpop.f32.mrb[12].mxu1  ;;  %v1576_v29 = vpop.f32.mrb[12].mxu0 }
 0x31f   :  { %v3806_v30 = vadd.f32 %v1495_v28, %v1024_v25  ;;  %v4613_v31 = vadd.f32 %v1576_v29, %v1537_v27  ;;  %v1497_v33 = vpop.f32.mrb[13].mxu1  ;;  %v3742_v34 = vpop.f32.mrb[13].mxu0  ;;  %v4160_v25 = vld [vmem:[#allocation8 + $0xc4] ss:$12 sps:$4 sm:$0xff]   ;;  %v4162_v27 = vld [vmem:[#allocation8 + $0x8] ss:$12 sps:$4 sm:$0xff]  }
 0x320   :  { %v3807_v35 = vadd.f32 %v1497_v33, %v1028_v26  ;;  %v1499_v36 = vpop.f32.mrb[14].mxu1  ;;  %v1579_v37 = vpop.f32.mrb[14].mxu0  ;;  %v4161_v26 = vld [vmem:[#allocation8 + $0xc8] ss:$12 sps:$4 sm:$0xff]   ;;  %v4158_v28 = vld [vmem:[#allocation8 + $0xc0] ss:$12 sps:$4 sm:$0xff]  }
 0x321   :  { %v1582_v38 = vmax.f32 %v3806_v30, 0.0  ;;  %v1500_v39 = vpop.f32.mrb[15].mxu1  ;;  %v3743_v40 = vpop.f32.mrb[15].mxu0  ;;  %v1584_v7 = vmax.f32 %v4613_v31, 0.0  ;;  %v4166_v29 = vld [vmem:[#allocation8 + $0xe0] ss:$12 sps:$4 sm:$0xff]  }
 0x322   :  { %v1583_v41 = vmax.f32 %v3807_v35, 0.0  ;;  %v4165_v30 = vld [vmem:[#allocation8 + $0xdc] ss:$12 sps:$4 sm:$0xff]   ;;  %v4167_v31 = vld [vmem:[#allocation8 + $0x20] ss:$12 sps:$4 sm:$0xff]  }
 0x323   :  { %v1585_v45 = vpack.c.bf16 %v1582_v38, %v1582_v38  ;;  %v1587_v10 = vpack.c.bf16 %v1584_v7, %v1584_v7  ;;  %v4171_v33 = vld [vmem:[#allocation8 + $0xf8] ss:$12 sps:$4 sm:$0xff]   ;;  %v4170_v35 = vld [vmem:[#allocation8 + $0xf4] ss:$12 sps:$4 sm:$0xff]   ;;  %v4176_v37 = vld [vmem:[#allocation8 + $0x110] ss:$12 sps:$4 sm:$0xff]  }
 0x324   :  { %v1586_v42 = vpack.c.bf16 %v1583_v41, %v1583_v41  ;;  %v4163_v34 = vld [vmem:[#allocation8 + $0xd8] ss:$12 sps:$4 sm:$0xff]   ;;  %v4168_v38 = vld [vmem:[#allocation8 + $0xf0] ss:$12 sps:$4 sm:$0xff]   ;;  %v4181_v41 = vld [vmem:[#allocation8 + $0x128] ss:$12 sps:$4 sm:$0xff]  }
 0x325   :  { %v4172_v36 = vld [vmem:[#allocation8 + $0x38] ss:$12 sps:$4 sm:$0xff]   ;;  %v4177_v40 = vld [vmem:[#allocation8 + $0x50] ss:$12 sps:$4 sm:$0xff]  }
 0x326   :  { %2117 = vmatprep.mubr.bf16.mxu0 %v1586_v42  ;;  %2199 = vmatprep.mubr.bf16.mxu1 %v1586_v42  ;;  %v4175_v39 = vld [vmem:[#allocation8 + $0x10c] ss:$12 sps:$4 sm:$0xff]   ;;  %v4173_v42 = vld [vmem:[#allocation8 + $0x108] ss:$12 sps:$4 sm:$0xff]  }
 0x327   :  { %2118 = vmatmul.mubr.bf16.vlgmr.msra.gmra.mrb[16].mxu0 %v1585_v45  ;;  %2200 = vmatmul.mubr.bf16.vlgmr.msra.gmra.mrb[16].mxu1 %v1585_v45  ;;  %v4186_v45 = vld [vmem:[#allocation8 + $0x140] ss:$12 sps:$4 sm:$0xff]  }
 0x328   :  { %2127 = vmatpush1.bf16.msra.mxu0 %v4102_v43  ;;  %3745 = vmatpush3.bf16.msra.mxu1 %v4105_v44  ;;  %v4180_v43 = vld [vmem:[#allocation8 + $0x124] ss:$12 sps:$4 sm:$0xff]   ;;  %v4182_v44 = vld [vmem:[#allocation8 + $0x68] ss:$12 sps:$4 sm:$0xff]  }
 0x329   :  { %2128 = vmatprep.subr.bf16.mxu0 %v4108_v46  ;;  %3746 = vmatprep.subr.bf16.mxu1 %v4380_v1  ;;  %v4178_v46 = vld [vmem:[#allocation8 + $0x120] ss:$12 sps:$4 sm:$0xff]  }
 0x32a   :  { %2158 = vmatprep.mubr.bf16.mxu0 %v4379_v0  ;;  %3760 = vmatprep.mubr.msk.bf16.mxu1 %vm4381_vm0, %v4380_v1 }
 0x32c   :  { %2129 = vmatpush1.bf16.msra.mxu0 %v4106_v47  ;;  %3747 = vmatpush3.bf16.msra.mxu1 %v4109_v48  ;;  %v4185_v47 = vld [vmem:[#allocation8 + $0x13c] ss:$12 sps:$4 sm:$0xff]   ;;  %v4187_v48 = vld [vmem:[#allocation8 + $0x80] ss:$12 sps:$4 sm:$0xff]  }
 0x32d   :  { %2130 = vmatprep.subr.bf16.mxu0 %v4112_v49  ;;  %3748 = vmatprep.subr.bf16.mxu1 %v4380_v1  ;;  %v4183_v49 = vld [vmem:[#allocation8 + $0x138] ss:$12 sps:$4 sm:$0xff]  }
 0x330   :  { %2131 = vmatpush1.bf16.msra.mxu0 %v4110_v50  ;;  %3749 = vmatpush3.bf16.msra.mxu1 %v4113_v51  ;;  %v4190_v50 = vld [vmem:[#allocation8 + $0x154] ss:$12 sps:$4 sm:$0xff]   ;;  %v4191_v51 = vld [vmem:[#allocation8 + $0x158] ss:$12 sps:$4 sm:$0xff]  }
 0x331   :  { %2132 = vmatprep.subr.bf16.mxu0 %v4116_v52  ;;  %3750 = vmatprep.subr.bf16.mxu1 %v4380_v1  ;;  %v4188_v52 = vld [vmem:[#allocation8 + $0x150] ss:$12 sps:$4 sm:$0xff]  }
 0x334   :  { %2133 = vmatpush1.bf16.msra.mxu0 %v4114_v53  ;;  %3751 = vmatpush3.bf16.msra.mxu1 %v4117_v54  ;;  %v4192_v53 = vld [vmem:[#allocation8 + $0x98] ss:$12 sps:$4 sm:$0xff]  }
 0x335   :  { %2134 = vmatprep.subr.bf16.mxu0 %v4120_v55  ;;  %3752 = vmatprep.subr.bf16.mxu1 %v4380_v1  ;;  %v4195_v54 = vld [vmem:[#allocation8 + $0x16c] ss:$12 sps:$4 sm:$0xff]   ;;  %v4196_v55 = vld [vmem:[#allocation8 + $0x170] ss:$12 sps:$4 sm:$0xff]  }
 0x338   :  { %2135 = vmatpush1.bf16.msra.mxu0 %v4118_v56  ;;  %3753 = vmatpush3.bf16.msra.mxu1 %v4121_v57  ;;  %v4193_v56 = vld [vmem:[#allocation8 + $0x168] ss:$12 sps:$4 sm:$0xff]   ;;  %v4197_v57 = vld [vmem:[#allocation8 + $0xb0] ss:$12 sps:$4 sm:$0xff]  }
 0x339   :  { %2136 = vmatprep.subr.bf16.mxu0 %v4124_v58  ;;  %3754 = vmatprep.subr.bf16.mxu1 %v4380_v1  ;;  %v4200_v58 = vld [vmem:[#allocation8 + $0x184] ss:$12 sps:$4 sm:$0xff]  }
 0x33c   :  { %2137 = vmatpush1.bf16.msra.mxu0 %v4122_v59  ;;  %3755 = vmatpush3.bf16.msra.mxu1 %v4125_v60 }
 0x33d   :  { %2138 = vmatprep.subr.bf16.mxu0 %v4128_v61  ;;  %3756 = vmatprep.subr.bf16.mxu1 %v4380_v1 }
 0x340   :  { %2139 = vmatpush1.bf16.msra.mxu0 %v4126_v62  ;;  %3757 = vmatpush3.bf16.msra.mxu1 %v4129_v2 }
 0x341   :  { %2140 = vmatprep.subr.bf16.mxu0 %v4132_v4  ;;  %3758 = vmatprep.subr.bf16.mxu1 %v4380_v1  ;;  %v1684_v4 = vld [vmem:[%s4761_s8] sm:$0x7] }
 0x342   :  { %v1693_v7 = vrot.slane %v1684_v4, %v4566_v3 }
 0x344   :  { %2141 = vmatpush1.bf16.msra.mxu0 %v4130_v5  ;;  %3759 = vmatpush3.bf16.msra.mxu1 %v4133_v6  ;;  %v1697_v5 = vrot.slane %v1684_v4, %v4578_v32  ;;  %v1689_v6 = vrot.slane %v1684_v4, %v4559_v63  ;;  %v4246_v4 = vld [vmem:[%s4764_s11 + $0x68] sm:$0xff]  }
 0x345   :  { %2750 = vmatprep.subr.bf16.mxu1 %v4136_v8  ;;  %3634 = vmatprep.subr.bf16.mxu0 %v4161_v26  ;;  %v4204_v26 = vld [vmem:[#allocation8 + $0x19c] ss:$12 sps:$4 sm:$0xff]  }
 0x347   :  { %2159 = vmatmul.mubr.bf16.vlgmr.msra.gmra.mrb[16].mxu0 %v1587_v10  ;;  %3761 = vmatmul.mubr.bf16.vlgmr.msra.gmra.mrb[20].mxu1 %v1587_v10 }
 0x348   :  { %2751 = vmatpush1.bf16.msra.mxu1 %v4134_v9  ;;  %3635 = vmatpush3.bf16.msra.mxu0 %v4162_v27  ;;  %v4202_v27 = vld [vmem:[#allocation8 + $0x198] ss:$12 sps:$4 sm:$0xff]  }
 0x349   :  { %2752 = vmatprep.subr.bf16.mxu1 %v4139_v11  ;;  %3636 = vmatprep.subr.bf16.mxu0 %v4166_v29  ;;  %v4208_v29 = vld [vmem:[#allocation8 + $0x1b4] ss:$12 sps:$4 sm:$0xff]  }
 0x34c   :  { %2753 = vmatpush1.bf16.msra.mxu1 %v4137_v12  ;;  %3637 = vmatpush3.bf16.msra.mxu0 %v4167_v31  ;;  %v4209_v31 = vld [vmem:[#allocation8 + $0x1b8] ss:$12 sps:$4 sm:$0xff]  }
 0x34d   :  { %2754 = vmatprep.subr.bf16.mxu1 %v4142_v13  ;;  %3638 = vmatprep.subr.bf16.mxu0 %v4171_v33  ;;  %v4212_v33 = vld [vmem:[#allocation8 + $0x1cc] ss:$12 sps:$4 sm:$0xff]  }
 0x350   :  { %2755 = vmatpush1.bf16.msra.mxu1 %v4140_v14  ;;  %3639 = vmatpush3.bf16.msra.mxu0 %v4172_v36  ;;  %v4216_v36 = vld [vmem:[#allocation8 + $0x1e4] ss:$12 sps:$4 sm:$0xff]  }
 0x351   :  { %2756 = vmatprep.subr.bf16.mxu1 %v4145_v15  ;;  %3640 = vmatprep.subr.bf16.mxu0 %v4176_v37  ;;  %v4217_v37 = vld [vmem:[#allocation8 + $0x1e8] ss:$12 sps:$4 sm:$0xff]  }
 0x354   :  { %2757 = vmatpush1.bf16.msra.mxu1 %v4143_v16  ;;  %3641 = vmatpush3.bf16.msra.mxu0 %v4177_v40  ;;  %v4221_v40 = vld [vmem:[#allocation8 + $0x200] ss:$12 sps:$4 sm:$0xff]  }
 0x355   :  { %2758 = vmatprep.subr.bf16.mxu1 %v4148_v17  ;;  %3642 = vmatprep.subr.bf16.mxu0 %v4181_v41  ;;  %v4224_v41 = vld [vmem:[#allocation8 + $0x214] ss:$12 sps:$4 sm:$0xff]  }
 0x358   :  { %2759 = vmatpush1.bf16.msra.mxu1 %v4146_v18  ;;  %3643 = vmatpush3.bf16.msra.mxu0 %v4182_v44  ;;  %v4228_v44 = vld [vmem:[#allocation8 + $0x22c] ss:$12 sps:$4 sm:$0xff]  }
 0x359   :  { %2760 = vmatprep.subr.bf16.mxu1 %v4151_v19  ;;  %3644 = vmatprep.subr.bf16.mxu0 %v4186_v45  ;;  %v4226_v45 = vld [vmem:[#allocation8 + $0x228] ss:$12 sps:$4 sm:$0xff]  }
 0x35c   :  { %2761 = vmatpush1.bf16.msra.mxu1 %v4149_v20  ;;  %3645 = vmatpush3.bf16.msra.mxu0 %v4187_v48 }
 0x35d   :  { %2762 = vmatprep.subr.bf16.mxu1 %v4154_v21  ;;  %3646 = vmatprep.subr.bf16.mxu0 %v4191_v51  ;;  %v4232_v51 = vld [vmem:[%s4764_s11] sm:$0xff]  }
 0x360   :  { %2763 = vmatpush1.bf16.msra.mxu1 %v4152_v22  ;;  %3647 = vmatpush3.bf16.msra.mxu0 %v4192_v53  ;;  %v4233_v53 = vld [vmem:[%s4764_s11 + $0x88] sm:$0xff]  }
 0x361   :  { %2764 = vmatprep.subr.bf16.mxu1 %v4157_v23  ;;  %3648 = vmatprep.subr.bf16.mxu0 %v4196_v55  ;;  %v4198_v23 = vld [vmem:[#allocation8 + $0x180] ss:$12 sps:$4 sm:$0xff]   ;;  %v4237_v55 = vld [vmem:[%s4764_s11 + $0x50] sm:$0xff]  }
 0x364   :  { %2765 = vmatpush1.bf16.msra.mxu1 %v4155_v24  ;;  %3649 = vmatpush3.bf16.msra.mxu0 %v4197_v57  ;;  %v4201_v24 = vld [vmem:[#allocation8 + $0x188] ss:$12 sps:$4 sm:$0xff]  }
 0x365   :  { %2766 = vmatprep.subr.bf16.mxu1 %v4160_v25  ;;  %3764 = vmatprep.subr.bf16.mxu0 %v4380_v1  ;;  %v4238_v57 = vld [vmem:[%s4764_s11 + $0x10] sm:$0xff]  }
 0x368   :  { %2767 = vmatpush1.bf16.msra.mxu1 %v4158_v28  ;;  %v4205_v28 = vld [vmem:[#allocation8 + $0x1a0] ss:$12 sps:$4 sm:$0xff]  }
 0x369   :  { %2768 = vmatprep.subr.bf16.mxu1 %v4165_v30  ;;  %v4206_v30 = vld [vmem:[#allocation8 + $0x1b0] ss:$12 sps:$4 sm:$0xff]  }
 0x36c   :  { %2769 = vmatpush1.bf16.msra.mxu1 %v4163_v34  ;;  %v4210_v34 = vld [vmem:[#allocation8 + $0x1c8] ss:$12 sps:$4 sm:$0xff]  }
 0x36d   :  { %2770 = vmatprep.subr.bf16.mxu1 %v4170_v35  ;;  %v4213_v35 = vld [vmem:[#allocation8 + $0x1d0] ss:$12 sps:$4 sm:$0xff]  }
 0x370   :  { %2771 = vmatpush1.bf16.msra.mxu1 %v4168_v38  ;;  %v4220_v38 = vld [vmem:[#allocation8 + $0x1fc] ss:$12 sps:$4 sm:$0xff]  }
 0x371   :  { %2772 = vmatprep.subr.bf16.mxu1 %v4175_v39  ;;  %v4218_v39 = vld [vmem:[#allocation8 + $0x1f8] ss:$12 sps:$4 sm:$0xff]  }
 0x374   :  { %2773 = vmatpush1.bf16.msra.mxu1 %v4173_v42  ;;  %v4222_v42 = vld [vmem:[#allocation8 + $0x210] ss:$12 sps:$4 sm:$0xff]  }
 0x375   :  { %2774 = vmatprep.subr.bf16.mxu1 %v4180_v43  ;;  %v4225_v43 = vld [vmem:[#allocation8 + $0x218] ss:$12 sps:$4 sm:$0xff]  }
 0x378   :  { %2775 = vmatpush1.bf16.msra.mxu1 %v4178_v46  ;;  %v4229_v46 = vld [vmem:[#allocation8 + $0x230] ss:$12 sps:$4 sm:$0xff]  }
 0x379   :  { %2776 = vmatprep.subr.bf16.mxu1 %v4185_v47 }
 0x37c   :  { %2777 = vmatpush1.bf16.msra.mxu1 %v4183_v49  ;;  %v4230_v49 = vld [vmem:[%s4764_s11 + $0x80] sm:$0xff]  }
 0x37d   :  { %2778 = vmatprep.subr.bf16.mxu1 %v4190_v50  ;;  %v4231_v50 = vld [vmem:[%s4764_s11 + $0x40] sm:$0xff]  }
 0x380   :  { %2779 = vmatpush1.bf16.msra.mxu1 %v4188_v52  ;;  %v4234_v52 = vld [vmem:[%s4764_s11 + $0x48] sm:$0xff]  }
 0x381   :  { %2780 = vmatprep.subr.bf16.mxu1 %v4195_v54  ;;  %v4235_v54 = vld [vmem:[%s4764_s11 + $0x8] sm:$0xff]  }
 0x384   :  { %2781 = vmatpush1.bf16.msra.mxu1 %v4193_v56  ;;  %v4236_v56 = vld [vmem:[%s4764_s11 + $0x90] sm:$0xff]  }
 0x385   :  { %2791 = vmatprep.subr.bf16.mxu1 %v4200_v58  ;;  %v4240_v58 = vld [vmem:[%s4764_s11 + $0x58] sm:$0xff]  }
 0x3fa   :  { %v3619_v59 = vpop.f32.mrb[16].mxu1 }
 0x3fb   :  { %v3620_v60 = vpop.f32.mrb[17].mxu1 }
 0x3fc   :  { %v3621_v61 = vadd.f32 %v3620_v60, %v3619_v59  ;;  %v3622_v62 = vpop.f32.mrb[18].mxu1  ;;  %v4239_v59 = vld [vmem:[%s4764_s11 + $0x98] sm:$0xff]  }
 0x3fd   :  { %v3623_v2 = vpop.f32.mrb[19].mxu1  ;;  %v4241_v60 = vld [vmem:[%s4764_s11 + $0x18] sm:$0xff]   ;;  %v4242_v62 = vld [vmem:[%s4764_s11 + $0xa0] sm:$0xff]  }
 0x3fe   :  { %v2202_v8 = vadd.f32 %v3621_v61, %v1697_v5  ;;  %v4243_v61 = vld [vmem:[%s4764_s11 + $0x60] sm:$0xff]   ;;  %v4245_v5 = vld [vmem:[%s4764_s11 + $0xa8] sm:$0xff]  }
 0x3ff   :  { %v4244_v2 = vld [vmem:[%s4764_s11 + $0x20] sm:$0xff]  }
 0x41a   :  { %v2160_v9 = vpop.f32.mrb[16].mxu0  ;;  %v2241_v10 = vpop.f32.mrb[20].mxu1 }
 0x41b   :  { %v3808_v11 = vadd.f32 %v2160_v9, %v1689_v6  ;;  %v4633_v12 = vadd.f32 %v2241_v10, %v2202_v8  ;;  %v2162_v13 = vpop.f32.mrb[17].mxu0  ;;  %v3762_v14 = vpop.f32.mrb[21].mxu1  ;;  %v4247_v6 = vld [vmem:[%s4764_s11 + $0x28] sm:$0xff]   ;;  %v4249_v8 = vld [vmem:[%s4764_s11 + $0x70] sm:$0xff]   ;;  %v4251_v10 = vld [vmem:[%s4764_s11 + $0xb8] sm:$0xff]  }
 0x41c   :  { %v3809_v15 = vadd.f32 %v2162_v13, %v1693_v7  ;;  %v2164_v16 = vpop.f32.mrb[18].mxu0  ;;  %v2244_v17 = vpop.f32.mrb[22].mxu1  ;;  %v4248_v7 = vld [vmem:[%s4764_s11 + $0xb0] sm:$0xff]  }
 0x41d   :  { %v2247_v18 = vmax.f32 %v3808_v11, 0.0  ;;  %v2165_v19 = vpop.f32.mrb[19].mxu0  ;;  %v3763_v20 = vpop.f32.mrb[23].mxu1  ;;  %v2249_v47 = vmax.f32 %v4633_v12, 0.0  ;;  %v4250_v9 = vld [vmem:[%s4764_s11 + $0x30] sm:$0xff]   ;;  %v4252_v11 = vld [vmem:[%s4764_s11 + $0x78] sm:$0xff]  }
 0x41e   :  { %v2248_v21 = vmax.f32 %v3809_v15, 0.0  ;;  %v4253_v12 = vld [vmem:[%s4764_s11 + $0x38] sm:$0xff]   ;;  %v2349_v17 = vld [vmem:[%s4763_s10] sm:$0x7] }
 0x41f   :  { %v2250_v25 = vpack.c.bf16 %v2247_v18, %v2247_v18  ;;  %v2252_v48 = vpack.c.bf16 %v2249_v47, %v2249_v47  ;;  %v2362_v18 = vrot.slane %v2349_v17, %v4578_v32  ;;  %v2354_v19 = vrot.slane %v2349_v17, %v4559_v63 }
 0x420   :  { %v2251_v22 = vpack.c.bf16 %v2248_v21, %v2248_v21  ;;  %v2358_v20 = vrot.slane %v2349_v17, %v4566_v3 }
 0x422   :  { %2782 = vmatprep.mubr.bf16.mxu1 %v2251_v22  ;;  %2864 = vmatprep.mubr.bf16.mxu0 %v2251_v22 }
 0x423   :  { %2783 = vmatmul.mubr.bf16.vlgmr.msra.gmra.mrb[24].mxu1 %v2250_v25  ;;  %2865 = vmatmul.mubr.bf16.vlgmr.msra.gmra.mrb[20].mxu0 %v2250_v25 }
 0x424   :  { %2792 = vmatpush1.bf16.msra.mxu1 %v4198_v23  ;;  %3765 = vmatpush3.bf16.msra.mxu0 %v4201_v24 }
 0x425   :  { %2793 = vmatprep.subr.bf16.mxu1 %v4204_v26  ;;  %3766 = vmatprep.subr.bf16.mxu0 %v4380_v1 }
 0x426   :  { %2823 = vmatprep.mubr.bf16.mxu1 %v4379_v0  ;;  %3780 = vmatprep.mubr.msk.bf16.mxu0 %vm4381_vm0, %v4380_v1  ;;  %v4214_v0 = vld [vmem:[#allocation8 + $0x1e0] ss:$12 sps:$4 sm:$0xff]  }
 0x428   :  { %2794 = vmatpush1.bf16.msra.mxu1 %v4202_v27  ;;  %3767 = vmatpush3.bf16.msra.mxu0 %v4205_v28 }
 0x429   :  { %2795 = vmatprep.subr.bf16.mxu1 %v4208_v29  ;;  %3768 = vmatprep.subr.bf16.mxu0 %v4380_v1 }
 0x42c   :  { %2796 = vmatpush1.bf16.msra.mxu1 %v4206_v30  ;;  %3769 = vmatpush3.bf16.msra.mxu0 %v4209_v31 }
 0x42d   :  { %2797 = vmatprep.subr.bf16.mxu1 %v4212_v33  ;;  %3770 = vmatprep.subr.bf16.mxu0 %v4380_v1 }
 0x430   :  { %2798 = vmatpush1.bf16.msra.mxu1 %v4210_v34  ;;  %3771 = vmatpush3.bf16.msra.mxu0 %v4213_v35 }
 0x431   :  { %2799 = vmatprep.subr.bf16.mxu1 %v4216_v36  ;;  %3772 = vmatprep.subr.bf16.mxu0 %v4380_v1 }
 0x434   :  { %2800 = vmatpush1.bf16.msra.mxu1 %v4214_v0  ;;  %3773 = vmatpush3.bf16.msra.mxu0 %v4217_v37 }
 0x435   :  { %2801 = vmatprep.subr.bf16.mxu1 %v4220_v38  ;;  %3774 = vmatprep.subr.bf16.mxu0 %v4380_v1 }
 0x438   :  { %2802 = vmatpush1.bf16.msra.mxu1 %v4218_v39  ;;  %3775 = vmatpush3.bf16.msra.mxu0 %v4221_v40  ;;  %v3513_v40 = vld [vmem:[%s4765_s12] ss:$0 sm:$0xff] }
 0x439   :  { %2803 = vmatprep.subr.bf16.mxu1 %v4224_v41  ;;  %3776 = vmatprep.subr.bf16.mxu0 %v4380_v1 }
 0x43c   :  { %2804 = vmatpush1.bf16.msra.mxu1 %v4222_v42  ;;  %3777 = vmatpush3.bf16.msra.mxu0 %v4225_v43 }
 0x43d   :  { %2805 = vmatprep.subr.bf16.mxu1 %v4228_v44  ;;  %3778 = vmatprep.subr.bf16.mxu0 %v4380_v1 }
 0x440   :  { %2806 = vmatpush1.bf16.msra.mxu1 %v4226_v45  ;;  %3779 = vmatpush3.bf16.msra.mxu0 %v4229_v46 }
 0x441   :  { %3784 = vmatprep.subr.bf16.mxu1 %v4380_v1  ;;  %3665 = vmatprep.subr.bf16.mxu0 %v4231_v50 }
 0x443   :  { %2824 = vmatmul.mubr.bf16.vlgmr.msra.gmra.mrb[24].mxu1 %v2252_v48  ;;  %3781 = vmatmul.mubr.bf16.vlgmr.msra.gmra.mrb[24].mxu0 %v2252_v48  ;;  %v4254_v48 = vld [vmem:[%s4753_s0] sm:$0xff] }
 0x444   :  { %3800 = vmatprep.mubr.msk.bf16.mxu1 %vm4381_vm0, %v4380_v1  ;;  %3785 = vmatpush3.bf16.msra.mxu1 %v4230_v49 }
 0x445   :  { %3666 = vmatpush3.bf16.msra.mxu0 %v4232_v51  ;;  %3786 = vmatprep.subr.bf16.mxu1 %v4380_v1 }
 0x446   :  { %3667 = vmatprep.subr.bf16.mxu0 %v4234_v52 }
 0x448   :  { %3787 = vmatpush3.bf16.msra.mxu1 %v4233_v53 }
 0x449   :  { %3668 = vmatpush3.bf16.msra.mxu0 %v4235_v54  ;;  %3788 = vmatprep.subr.bf16.mxu1 %v4380_v1 }
 0x44a   :  { %3669 = vmatprep.subr.bf16.mxu0 %v4237_v55 }
 0x44c   :  { %3789 = vmatpush3.bf16.msra.mxu1 %v4236_v56 }
 0x44d   :  { %3670 = vmatpush3.bf16.msra.mxu0 %v4238_v57  ;;  %3790 = vmatprep.subr.bf16.mxu1 %v4380_v1 }
 0x44e   :  { %3671 = vmatprep.subr.bf16.mxu0 %v4240_v58 }
 0x450   :  { %3791 = vmatpush3.bf16.msra.mxu1 %v4239_v59 }
 0x451   :  { %3672 = vmatpush3.bf16.msra.mxu0 %v4241_v60  ;;  %3792 = vmatprep.subr.bf16.mxu1 %v4380_v1 }
 0x452   :  { %3673 = vmatprep.subr.bf16.mxu0 %v4243_v61 }
 0x454   :  { %3793 = vmatpush3.bf16.msra.mxu1 %v4242_v62 }
 0x455   :  { %3674 = vmatpush3.bf16.msra.mxu0 %v4244_v2  ;;  %3794 = vmatprep.subr.bf16.mxu1 %v4380_v1 }
 0x456   :  { %3675 = vmatprep.subr.bf16.mxu0 %v4246_v4 }
 0x458   :  { %3795 = vmatpush3.bf16.msra.mxu1 %v4245_v5 }
 0x459   :  { %3676 = vmatpush3.bf16.msra.mxu0 %v4247_v6  ;;  %3796 = vmatprep.subr.bf16.mxu1 %v4380_v1 }
 0x45a   :  { %3677 = vmatprep.subr.bf16.mxu0 %v4249_v8 }
 0x45c   :  { %3797 = vmatpush3.bf16.msra.mxu1 %v4248_v7 }
 0x45d   :  { %3798 = vmatprep.subr.bf16.mxu1 %v4380_v1  ;;  %3678 = vmatpush3.bf16.msra.mxu0 %v4250_v9 }
 0x45e   :  { %3679 = vmatprep.subr.bf16.mxu0 %v4252_v11 }
 0x460   :  { %3799 = vmatpush3.bf16.msra.mxu1 %v4251_v10 }
 0x461   :  { %3680 = vmatpush3.bf16.msra.mxu0 %v4253_v12 }
 0x4f6   :  { %v3650_v13 = vpop.f32.mrb[20].mxu0 }
 0x4f7   :  { %v3651_v14 = vpop.f32.mrb[21].mxu0 }
 0x4f8   :  { %v3652_v15 = vadd.f32 %v3651_v14, %v3650_v13  ;;  %v3653_v1 = vpop.f32.mrb[22].mxu0 }
 0x4f9   :  { %v3654_v16 = vpop.f32.mrb[23].mxu0 }
 0x4fa   :  { %v2867_v21 = vadd.f32 %v3652_v15, %v2362_v18 }
 0x516   :  { %v2825_v22 = vpop.f32.mrb[24].mxu1  ;;  %v2906_v23 = vpop.f32.mrb[24].mxu0 }
 0x517   :  { %v3810_v24 = vadd.f32 %v2825_v22, %v2354_v19  ;;  %v2907_v25 = vadd.f32 %v2906_v23, %v2867_v21  ;;  %v2827_v26 = vpop.f32.mrb[25].mxu1  ;;  %v3782_v27 = vpop.f32.mrb[25].mxu0 }
 0x518   :  { %v3811_v28 = vadd.f32 %v2827_v26, %v2358_v20  ;;  %v2829_v29 = vpop.f32.mrb[26].mxu1  ;;  %v2909_v30 = vpop.f32.mrb[26].mxu0 }
 0x519   :  { %v2912_v31 = vmax.f32 %v3810_v24, 0.0  ;;  %v2914_v33 = vmax.f32 %v2907_v25, 0.0  ;;  %v2830_v34 = vpop.f32.mrb[27].mxu1  ;;  %v3783_v35 = vpop.f32.mrb[27].mxu0 }
 0x51a   :  { %v2913_v36 = vmax.f32 %v3811_v28, 0.0 }
 0x51b   :  { %v2917_v32 = vpack.c.bf16 %v2914_v33, %v2914_v33  ;;  %v2915_v63 = vpack.c.bf16 %v2912_v31, %v2912_v31 }
 0x51c   :  { %v2916_v0 = vpack.c.bf16 %v2913_v36, %v2913_v36 }
 0x51d   :  { %3801 = vmatmul.mubr.bf16.vlgmr.msra.gmra.mrb[28].mxu1 %v2917_v32 }
 0x51e   :  { %3149 = vmatprep.mubr.bf16.mxu0 %v2916_v0 }
 0x51f   :  { %3150 = vmatmul.mubr.bf16.vlgmr.msra.gmra.mrb[28].mxu0 %v2915_v63 }
 0x5f0   :  { %v3191_v3 = vpop.f32.mrb[28].mxu1 }
 0x5f1   :  { %v3802_v37 = vpop.f32.mrb[29].mxu1 }
 0x5f2   :  { %v3681_v38 = vpop.f32.mrb[28].mxu0  ;;  %v3194_v39 = vpop.f32.mrb[30].mxu1 }
 0x5f3   :  { %v3682_v41 = vpop.f32.mrb[29].mxu0  ;;  %v3803_v42 = vpop.f32.mrb[31].mxu1 }
 0x5f4   :  { %v3683_v43 = vadd.f32 %v3682_v41, %v3681_v38  ;;  %v3684_v44 = vpop.f32.mrb[30].mxu0 }
 0x5f5   :  { %v3685_v45 = vpop.f32.mrb[31].mxu0 }
 0x5f6   :  { %v3152_v46 = vadd.f32 %v3683_v43, %v3513_v40 }
 0x5f8   :  { %v3192_v47 = vadd.f32 %v3191_v3, %v3152_v46 }
 0x5fa   :  { %v3197_v49 = vadd.f32 %v4254_v48, %v3192_v47 }
 0x5fc   :  { %3198 = vst.msk [vmem:[#allocation10] sm:$0xff] %vm157_vm2, %v3197_v49 }
 0x5fd   :  { %4354 = shalt.err (!%p4351_p8)
}
 0x5fe   :  { %s4355_s27 = scalar_lea.hbm %s4766_s13, 128 }
 0x5ff   :  { %p4356_p9 = scmp.ne.s32.totalorder %s4766_s13, %s4355_s27  ;;  %p4359_p10 = scmp.lt.u32.totalorder %s4355_s27, %s4766_s13 }
 0x601   :  { %p4361_p11 = pnand %p4359_p10, %p4356_p9 }
 0x603   :  { %4364 = shalt.err (!%p4361_p11)
}
 0x604   :  { %3208 = dma.vmem_to_hbm [thread:$0]  %s3206_s24, 128, %s4766_s13, [#allocation4]  }
 0x605   :  { %4371 = dma.done.wait [#allocation4], 128  }
 0x606   :  { %4372 = vsyncadd [#allocation4], 4294967168 }
 0x607   :  { %3212 = vsyncpa [#allocation3], 1 }
 0x608   :  { %3213 = vsyncpa [#allocation6], 1 }
 0x609   :  { %3214 = vsyncpa [#allocation9], 1 }
 0x60a   :  { %3215 = vsyncpa [#allocation4], 1 }

</bundles_post_ra>
